<compile_context>
chip_gen: v7x
topology: tpu7x:2x2x1
jax: 0.10.0
libtpu: 0.0.40
codegen_flags: <defaults>
</compile_context>

<pallas_src>
import functools
import math

import jax
import jax.numpy as jnp
from jax import lax
from jax.experimental import pallas as pl
from jax.experimental.pallas import tpu as pltpu


def _mhsa_kernel(x_ref, pe_ref, wqkv_ref, bqkv_ref, wo_ref, bo_ref, o_ref, *,
                 num_heads, dim_per_head):
    """One grid step = one batch element.  All heads computed in this step."""
    C = x_ref.shape[-1]
    D = dim_per_head
    scale = 1.0 / math.sqrt(D)

    # Positional encoding added once per batch tile (shared Q/KV source).
    xh = x_ref[...] + pe_ref[...]                                       # (S, C)

    # Fused Q/K/V projection for all heads: one MXU push, contraction = C.
    qkv = jnp.dot(xh, wqkv_ref[...],
                  preferred_element_type=jnp.float32) + bqkv_ref[...]   # (S, 3C)

    heads = []
    for h in range(num_heads):                                          # unrolled
        lo = h * D
        q = qkv[:, lo:lo + D]                                            # (S, D)
        k = qkv[:, C + lo:C + lo + D]                                    # (S, D)
        v = qkv[:, 2 * C + lo:2 * C + lo + D]                            # (S, D)

        # q @ k^T without materializing a transpose: contract dim 1 of both.
        s = lax.dot_general(q, k, (((1,), (1,)), ((), ())),
                            preferred_element_type=jnp.float32) * scale  # (S, S)
        s = s - jnp.max(s, axis=-1, keepdims=True)
        p = jnp.exp(s)
        attn = p * pl.reciprocal(jnp.sum(p, axis=-1, keepdims=True),
                                 approx=False)
        heads.append(jnp.dot(attn, v, preferred_element_type=jnp.float32))

    comb = jnp.concatenate(heads, axis=-1)                               # (S, C)
    out = jnp.dot(comb, wo_ref[...],
                  preferred_element_type=jnp.float32) + bo_ref[...]      # (S, C)
    o_ref[...] = out.astype(o_ref.dtype)


def _block_diag(blocks):
    """blocks: (NH, Din, Dout) -> (NH*Din, NH*Dout) block-diagonal matrix."""
    nh, din, dout = blocks.shape
    out = jnp.zeros((nh * din, nh * dout), blocks.dtype)
    for h in range(nh):
        out = out.at[h * din:(h + 1) * din, h * dout:(h + 1) * dout].set(blocks[h])
    return out


def multi_head_self_attention(x, params, *, num_heads, height, width):
    """x: (B, C, H, W) float32, NCHW (PyTorch convention)."""
    B, C, H, W = x.shape
    assert H == height and W == width
    assert C % num_heads == 0
    S = height * width
    D = C // num_heads

    # torch `.view(B, H*W, -1)` — row-major reinterpretation, not a transpose.
    x_seq = x.reshape(B, S, C)

    # Per-head Linear(D, D) layers only touch their own channel slice, so the
    # Q/K/V projections of all heads fuse exactly into one (C, 3C) matmul with
    # block-diagonal weights (stored transposed so the kernel does x @ W^T).
    wq_bd = _block_diag(jnp.transpose(params["wq"], (0, 2, 1)))
    wk_bd = _block_diag(jnp.transpose(params["wk"], (0, 2, 1)))
    wv_bd = _block_diag(jnp.transpose(params["wv"], (0, 2, 1)))
    w_qkv = jnp.concatenate([wq_bd, wk_bd, wv_bd], axis=1)              # (C, 3C)
    b_qkv = jnp.concatenate([params["bq"].reshape(-1),
                             params["bk"].reshape(-1),
                             params["bv"].reshape(-1)]).reshape(1, 3 * C)

    wo_t = params["wo"].T                                               # (C, C)
    bo = params["bo"].reshape(1, C)
    pe = params["pe"]                                                   # (S, C)

    kernel = functools.partial(_mhsa_kernel,
                               num_heads=num_heads, dim_per_head=D)

    def const_spec(*shape):  # block index never changes -> DMA'd once, resident
        return pl.BlockSpec(shape, lambda b: (0,) * len(shape))

    out = pl.pallas_call(
        kernel,
        out_shape=jax.ShapeDtypeStruct((B, S, C), jnp.float32),
        grid=(B,),
        in_specs=[
            pl.BlockSpec((None, S, C), lambda b: (b, 0, 0)),  # x, per batch
            const_spec(S, C),                                 # positional enc
            const_spec(C, 3 * C),                             # fused W_qkv
            const_spec(1, 3 * C),                             # fused b_qkv
            const_spec(C, C),                                 # W_out^T
            const_spec(1, C),                                 # b_out
        ],
        out_specs=pl.BlockSpec((None, S, C), lambda b: (b, 0, 0)),
        compiler_params=pltpu.CompilerParams(
            dimension_semantics=("parallel",),   # shard batch across TCs (v7x)
            vmem_limit_bytes=32 * 1024 * 1024),
    )(x_seq, pe, w_qkv, b_qkv, wo_t, bo)

    # torch `.view(B, -1, H, W)` — row-major reinterpretation back to NCHW.
    return out.reshape(B, C, height, width)


def _reference(x, params, *, num_heads, height, width):
    """Pure-JAX re-implementation of the PyTorch forward (for verification)."""
    B, C, H, W = x.shape
    S = height * width
    D = C // num_heads
    xs = x.reshape(B, S, C) + params["pe"][None]
    heads = []
    for i in range(num_heads):
        xh = xs[:, :, i * D:(i + 1) * D]
        q = xh @ params["wq"][i].T + params["bq"][i]
        k = xh @ params["wk"][i].T + params["bk"][i]
        v = xh @ params["wv"][i].T + params["bv"][i]
        sc = jnp.einsum("bsd,btd->bst", q, k) / math.sqrt(D)
        w = jax.nn.softmax(sc, axis=-1)
        heads.append(jnp.einsum("bst,btd->bsd", w, v))
    comb = jnp.concatenate(heads, axis=-1)
    out = comb @ params["wo"].T + params["bo"]
    return out.reshape(B, C, height, width)


def init_params(key, channels, num_heads, height, width):
    D = channels // num_heads
    ks = jax.random.split(key, 9)
    scale_h = 1.0 / math.sqrt(D)
    scale_c = 1.0 / math.sqrt(channels)
    return {
        "wq": jax.random.uniform(ks[0], (num_heads, D, D), jnp.float32, -scale_h, scale_h),
        "bq": jax.random.uniform(ks[1], (num_heads, D), jnp.float32, -scale_h, scale_h),
        "wk": jax.random.uniform(ks[2], (num_heads, D, D), jnp.float32, -scale_h, scale_h),
        "bk": jax.random.uniform(ks[3], (num_heads, D), jnp.float32, -scale_h, scale_h),
        "wv": jax.random.uniform(ks[4], (num_heads, D, D), jnp.float32, -scale_h, scale_h),
        "bv": jax.random.uniform(ks[5], (num_heads, D), jnp.float32, -scale_h, scale_h),
        "pe": jax.random.normal(ks[6], (height * width, channels), jnp.float32),
        "wo": jax.random.uniform(ks[7], (channels, channels), jnp.float32, -scale_c, scale_c),
        "bo": jax.random.uniform(ks[8], (channels,), jnp.float32, -scale_c, scale_c),
    }


if __name__ == "__main__":
    channels, num_heads, height, width = 32, 4, 8, 8
    B = 2

    key = jax.random.PRNGKey(0)
    kx, kp = jax.random.split(key)
    x = jax.random.normal(kx, (B, channels, height, width), jnp.float32)
    params = init_params(kp, channels, num_heads, height, width)

    out = multi_head_self_attention(x, params, num_heads=num_heads,
                                    height=height, width=width)
    out = jax.block_until_ready(out)

    ref = _reference(x, params, num_heads=num_heads, height=height, width=width)
    assert out.shape == (B, channels, height, width)
    assert jnp.allclose(out, ref, atol=1e-4, rtol=1e-4), "mismatch vs reference"

    print("KERNEL_OK")
</pallas_src>

<mosaic_0001>
module attributes {stable_mosaic.version = 11 : i64} {
  func.func @_mhsa_kernel(%arg0: i32, %arg1: memref<1x64x32xf32, #tpu.memory_space<vmem>>, %arg2: memref<64x32xf32, #tpu.memory_space<vmem>>, %arg3: memref<32x96xf32, #tpu.memory_space<vmem>>, %arg4: memref<1x96xf32, #tpu.memory_space<vmem>>, %arg5: memref<32x32xf32, #tpu.memory_space<vmem>>, %arg6: memref<1x32xf32, #tpu.memory_space<vmem>>, %arg7: memref<1x64x32xf32, #tpu.memory_space<vmem>>) attributes {dimension_semantics = [#tpu.dimension_semantics<parallel>], iteration_bounds = array<i64: 2>, scalar_prefetch = 0 : i64, scratch_operands = 0 : i64, tpu.core_type = #tpu.core_type<tc>, window_params = [{transform_indices = @transform_0, window_bounds = array<i64: 1, 64, 32>}, {pipeline_mode = #tpu.pipeline_mode<synchronous>, transform_indices = @transform_1, window_bounds = array<i64: 64, 32>}, {pipeline_mode = #tpu.pipeline_mode<synchronous>, transform_indices = @transform_2, window_bounds = array<i64: 32, 96>}, {pipeline_mode = #tpu.pipeline_mode<synchronous>, transform_indices = @transform_3, window_bounds = array<i64: 1, 96>}, {pipeline_mode = #tpu.pipeline_mode<synchronous>, transform_indices = @transform_4, window_bounds = array<i64: 32, 32>}, {pipeline_mode = #tpu.pipeline_mode<synchronous>, transform_indices = @transform_5, window_bounds = array<i64: 1, 32>}, {transform_indices = @transform_6, window_bounds = array<i64: 1, 64, 32>}]} {
    %c0 = arith.constant 0 : index
    %c0_0 = arith.constant 0 : index
    %c0_1 = arith.constant 0 : index
    %0 = vector.load %arg1[%c0, %c0_0, %c0_1] : memref<1x64x32xf32, #tpu.memory_space<vmem>>, vector<1x64x32xf32>
    %1 = vector.shape_cast %0 : vector<1x64x32xf32> to vector<64x32xf32>
    %c0_2 = arith.constant 0 : index
    %c0_3 = arith.constant 0 : index
    %2 = vector.load %arg2[%c0_2, %c0_3] : memref<64x32xf32, #tpu.memory_space<vmem>>, vector<64x32xf32>
    %3 = arith.addf %1, %2 : vector<64x32xf32>
    %c0_4 = arith.constant 0 : index
    %c0_5 = arith.constant 0 : index
    %4 = vector.load %arg3[%c0_4, %c0_5] : memref<32x96xf32, #tpu.memory_space<vmem>>, vector<32x96xf32>
    %cst = arith.constant dense<0.000000e+00> : vector<64x96xf32>
    %5 = tpu.matmul %3, %4, %cst {dimension_numbers = #tpu.dot_dimension_numbers<[1], [0], [0], [1], [0, 0, 1, 1], [], []>} : vector<64x32xf32>, vector<32x96xf32>, vector<64x96xf32> -> vector<64x96xf32>
    %c0_6 = arith.constant 0 : index
    %c0_7 = arith.constant 0 : index
    %6 = vector.load %arg4[%c0_6, %c0_7] : memref<1x96xf32, #tpu.memory_space<vmem>>, vector<1x96xf32>
    %7 = vector.broadcast %6 : vector<1x96xf32> to vector<64x96xf32>
    %8 = arith.addf %5, %7 : vector<64x96xf32>
    %9 = vector.extract_strided_slice %8 {offsets = [0, 0], sizes = [64, 8], strides = [1, 1]} : vector<64x96xf32> to vector<64x8xf32>
    %10 = vector.extract_strided_slice %8 {offsets = [0, 32], sizes = [64, 8], strides = [1, 1]} : vector<64x96xf32> to vector<64x8xf32>
    %11 = vector.extract_strided_slice %8 {offsets = [0, 64], sizes = [64, 8], strides = [1, 1]} : vector<64x96xf32> to vector<64x8xf32>
    %cst_8 = arith.constant dense<0.000000e+00> : vector<64x64xf32>
    %12 = tpu.matmul %9, %10, %cst_8 {dimension_numbers = #tpu.dot_dimension_numbers<[1], [1], [0], [0], [0, 0, 1, 0], [], []>} : vector<64x8xf32>, vector<64x8xf32>, vector<64x64xf32> -> vector<64x64xf32>
    %cst_9 = arith.constant 0.353553385 : f32
    %13 = vector.broadcast %cst_9 : f32 to vector<64x64xf32>
    %14 = arith.mulf %12, %13 : vector<64x64xf32>
    %cst_10 = arith.constant dense<0xFF800000> : vector<64xf32>
    %15 = vector.multi_reduction <maximumf>, %14, %cst_10 [1] : vector<64x64xf32> to vector<64xf32>
    %16 = vector.shape_cast %15 : vector<64xf32> to vector<64x1xf32>
    %17 = vector.broadcast %16 : vector<64x1xf32> to vector<64x64xf32>
    %18 = arith.subf %14, %17 : vector<64x64xf32>
    %19 = math.exp %18 : vector<64x64xf32>
    %cst_11 = arith.constant dense<0.000000e+00> : vector<64xf32>
    %20 = vector.multi_reduction <add>, %19, %cst_11 [1] : vector<64x64xf32> to vector<64xf32>
    %21 = vector.shape_cast %20 : vector<64xf32> to vector<64x1xf32>
    %22 = tpu.reciprocal %21 : vector<64x1xf32> -> vector<64x1xf32>
    %23 = vector.broadcast %22 : vector<64x1xf32> to vector<64x64xf32>
    %24 = arith.mulf %19, %23 : vector<64x64xf32>
    %cst_12 = arith.constant dense<0.000000e+00> : vector<64x8xf32>
    %25 = tpu.matmul %24, %11, %cst_12 {dimension_numbers = #tpu.dot_dimension_numbers<[1], [0], [0], [1], [0, 0, 1, 1], [], []>} : vector<64x64xf32>, vector<64x8xf32>, vector<64x8xf32> -> vector<64x8xf32>
    %26 = vector.extract_strided_slice %8 {offsets = [0, 8], sizes = [64, 8], strides = [1, 1]} : vector<64x96xf32> to vector<64x8xf32>
    %27 = vector.extract_strided_slice %8 {offsets = [0, 40], sizes = [64, 8], strides = [1, 1]} : vector<64x96xf32> to vector<64x8xf32>
    %28 = vector.extract_strided_slice %8 {offsets = [0, 72], sizes = [64, 8], strides = [1, 1]} : vector<64x96xf32> to vector<64x8xf32>
    %cst_13 = arith.constant dense<0.000000e+00> : vector<64x64xf32>
    %29 = tpu.matmul %26, %27, %cst_13 {dimension_numbers = #tpu.dot_dimension_numbers<[1], [1], [0], [0], [0, 0, 1, 0], [], []>} : vector<64x8xf32>, vector<64x8xf32>, vector<64x64xf32> -> vector<64x64xf32>
    %cst_14 = arith.constant 0.353553385 : f32
    %30 = vector.broadcast %cst_14 : f32 to vector<64x64xf32>
    %31 = arith.mulf %29, %30 : vector<64x64xf32>
    %cst_15 = arith.constant dense<0xFF800000> : vector<64xf32>
    %32 = vector.multi_reduction <maximumf>, %31, %cst_15 [1] : vector<64x64xf32> to vector<64xf32>
    %33 = vector.shape_cast %32 : vector<64xf32> to vector<64x1xf32>
    %34 = vector.broadcast %33 : vector<64x1xf32> to vector<64x64xf32>
    %35 = arith.subf %31, %34 : vector<64x64xf32>
    %36 = math.exp %35 : vector<64x64xf32>
    %cst_16 = arith.constant dense<0.000000e+00> : vector<64xf32>
    %37 = vector.multi_reduction <add>, %36, %cst_16 [1] : vector<64x64xf32> to vector<64xf32>
    %38 = vector.shape_cast %37 : vector<64xf32> to vector<64x1xf32>
    %39 = tpu.reciprocal %38 : vector<64x1xf32> -> vector<64x1xf32>
    %40 = vector.broadcast %39 : vector<64x1xf32> to vector<64x64xf32>
    %41 = arith.mulf %36, %40 : vector<64x64xf32>
    %cst_17 = arith.constant dense<0.000000e+00> : vector<64x8xf32>
    %42 = tpu.matmul %41, %28, %cst_17 {dimension_numbers = #tpu.dot_dimension_numbers<[1], [0], [0], [1], [0, 0, 1, 1], [], []>} : vector<64x64xf32>, vector<64x8xf32>, vector<64x8xf32> -> vector<64x8xf32>
    %43 = vector.extract_strided_slice %8 {offsets = [0, 16], sizes = [64, 8], strides = [1, 1]} : vector<64x96xf32> to vector<64x8xf32>
    %44 = vector.extract_strided_slice %8 {offsets = [0, 48], sizes = [64, 8], strides = [1, 1]} : vector<64x96xf32> to vector<64x8xf32>
    %45 = vector.extract_strided_slice %8 {offsets = [0, 80], sizes = [64, 8], strides = [1, 1]} : vector<64x96xf32> to vector<64x8xf32>
    %cst_18 = arith.constant dense<0.000000e+00> : vector<64x64xf32>
    %46 = tpu.matmul %43, %44, %cst_18 {dimension_numbers = #tpu.dot_dimension_numbers<[1], [1], [0], [0], [0, 0, 1, 0], [], []>} : vector<64x8xf32>, vector<64x8xf32>, vector<64x64xf32> -> vector<64x64xf32>
    %cst_19 = arith.constant 0.353553385 : f32
    %47 = vector.broadcast %cst_19 : f32 to vector<64x64xf32>
    %48 = arith.mulf %46, %47 : vector<64x64xf32>
    %cst_20 = arith.constant dense<0xFF800000> : vector<64xf32>
    %49 = vector.multi_reduction <maximumf>, %48, %cst_20 [1] : vector<64x64xf32> to vector<64xf32>
    %50 = vector.shape_cast %49 : vector<64xf32> to vector<64x1xf32>
    %51 = vector.broadcast %50 : vector<64x1xf32> to vector<64x64xf32>
    %52 = arith.subf %48, %51 : vector<64x64xf32>
    %53 = math.exp %52 : vector<64x64xf32>
    %cst_21 = arith.constant dense<0.000000e+00> : vector<64xf32>
    %54 = vector.multi_reduction <add>, %53, %cst_21 [1] : vector<64x64xf32> to vector<64xf32>
    %55 = vector.shape_cast %54 : vector<64xf32> to vector<64x1xf32>
    %56 = tpu.reciprocal %55 : vector<64x1xf32> -> vector<64x1xf32>
    %57 = vector.broadcast %56 : vector<64x1xf32> to vector<64x64xf32>
    %58 = arith.mulf %53, %57 : vector<64x64xf32>
    %cst_22 = arith.constant dense<0.000000e+00> : vector<64x8xf32>
    %59 = tpu.matmul %58, %45, %cst_22 {dimension_numbers = #tpu.dot_dimension_numbers<[1], [0], [0], [1], [0, 0, 1, 1], [], []>} : vector<64x64xf32>, vector<64x8xf32>, vector<64x8xf32> -> vector<64x8xf32>
    %60 = vector.extract_strided_slice %8 {offsets = [0, 24], sizes = [64, 8], strides = [1, 1]} : vector<64x96xf32> to vector<64x8xf32>
    %61 = vector.extract_strided_slice %8 {offsets = [0, 56], sizes = [64, 8], strides = [1, 1]} : vector<64x96xf32> to vector<64x8xf32>
    %62 = vector.extract_strided_slice %8 {offsets = [0, 88], sizes = [64, 8], strides = [1, 1]} : vector<64x96xf32> to vector<64x8xf32>
    %cst_23 = arith.constant dense<0.000000e+00> : vector<64x64xf32>
    %63 = tpu.matmul %60, %61, %cst_23 {dimension_numbers = #tpu.dot_dimension_numbers<[1], [1], [0], [0], [0, 0, 1, 0], [], []>} : vector<64x8xf32>, vector<64x8xf32>, vector<64x64xf32> -> vector<64x64xf32>
    %cst_24 = arith.constant 0.353553385 : f32
    %64 = vector.broadcast %cst_24 : f32 to vector<64x64xf32>
    %65 = arith.mulf %63, %64 : vector<64x64xf32>
    %cst_25 = arith.constant dense<0xFF800000> : vector<64xf32>
    %66 = vector.multi_reduction <maximumf>, %65, %cst_25 [1] : vector<64x64xf32> to vector<64xf32>
    %67 = vector.shape_cast %66 : vector<64xf32> to vector<64x1xf32>
    %68 = vector.broadcast %67 : vector<64x1xf32> to vector<64x64xf32>
    %69 = arith.subf %65, %68 : vector<64x64xf32>
    %70 = math.exp %69 : vector<64x64xf32>
    %cst_26 = arith.constant dense<0.000000e+00> : vector<64xf32>
    %71 = vector.multi_reduction <add>, %70, %cst_26 [1] : vector<64x64xf32> to vector<64xf32>
    %72 = vector.shape_cast %71 : vector<64xf32> to vector<64x1xf32>
    %73 = tpu.reciprocal %72 : vector<64x1xf32> -> vector<64x1xf32>
    %74 = vector.broadcast %73 : vector<64x1xf32> to vector<64x64xf32>
    %75 = arith.mulf %70, %74 : vector<64x64xf32>
    %cst_27 = arith.constant dense<0.000000e+00> : vector<64x8xf32>
    %76 = tpu.matmul %75, %62, %cst_27 {dimension_numbers = #tpu.dot_dimension_numbers<[1], [0], [0], [1], [0, 0, 1, 1], [], []>} : vector<64x64xf32>, vector<64x8xf32>, vector<64x8xf32> -> vector<64x8xf32>
    %77 = tpu.concatenate %25, %42, %59, %76 in 1 : vector<64x8xf32>, vector<64x8xf32>, vector<64x8xf32>, vector<64x8xf32> -> vector<64x32xf32>
    %c0_28 = arith.constant 0 : index
    %c0_29 = arith.constant 0 : index
    %78 = vector.load %arg5[%c0_28, %c0_29] : memref<32x32xf32, #tpu.memory_space<vmem>>, vector<32x32xf32>
    %cst_30 = arith.constant dense<0.000000e+00> : vector<64x32xf32>
    %79 = tpu.matmul %77, %78, %cst_30 {dimension_numbers = #tpu.dot_dimension_numbers<[1], [0], [0], [1], [0, 0, 1, 1], [], []>} : vector<64x32xf32>, vector<32x32xf32>, vector<64x32xf32> -> vector<64x32xf32>
    %c0_31 = arith.constant 0 : index
    %c0_32 = arith.constant 0 : index
    %80 = vector.load %arg6[%c0_31, %c0_32] : memref<1x32xf32, #tpu.memory_space<vmem>>, vector<1x32xf32>
    %81 = vector.broadcast %80 : vector<1x32xf32> to vector<64x32xf32>
    %82 = arith.addf %79, %81 : vector<64x32xf32>
    %c0_33 = arith.constant 0 : index
    %c0_34 = arith.constant 0 : index
    %c0_35 = arith.constant 0 : index
    %83 = vector.load %arg7[%c0_33, %c0_34, %c0_35] : memref<1x64x32xf32, #tpu.memory_space<vmem>>, vector<1x64x32xf32>
    %84 = vector.shape_cast %83 : vector<1x64x32xf32> to vector<64x32xf32>
    %85 = vector.shape_cast %82 : vector<64x32xf32> to vector<1x64x32xf32>
    tpu.vector_store %arg7[%c0_33, %c0_34, %c0_35], %85 {strides = array<i32>} : memref<1x64x32xf32, #tpu.memory_space<vmem>>, vector<1x64x32xf32>,
    return
  }
  func.func @transform_0(%arg0: i32) -> (i32, i32, i32) {
    %c0_i32 = arith.constant 0 : i32
    %c0_i32_0 = arith.constant 0 : i32
    %c0_i32_1 = arith.constant 0 : i32
    return %arg0, %c0_i32, %c0_i32_0 : i32, i32, i32
  }
  func.func @transform_1(%arg0: i32) -> (i32, i32) {
    %c0_i32 = arith.constant 0 : i32
    %c0_i32_0 = arith.constant 0 : i32
    %c0_i32_1 = arith.constant 0 : i32
    return %c0_i32, %c0_i32_0 : i32, i32
  }
  func.func @transform_2(%arg0: i32) -> (i32, i32) {
    %c0_i32 = arith.constant 0 : i32
    %c0_i32_0 = arith.constant 0 : i32
    %c0_i32_1 = arith.constant 0 : i32
    return %c0_i32, %c0_i32_0 : i32, i32
  }
  func.func @transform_3(%arg0: i32) -> (i32, i32) {
    %c0_i32 = arith.constant 0 : i32
    %c0_i32_0 = arith.constant 0 : i32
    %c0_i32_1 = arith.constant 0 : i32
    return %c0_i32, %c0_i32_0 : i32, i32
  }
  func.func @transform_4(%arg0: i32) -> (i32, i32) {
    %c0_i32 = arith.constant 0 : i32
    %c0_i32_0 = arith.constant 0 : i32
    %c0_i32_1 = arith.constant 0 : i32
    return %c0_i32, %c0_i32_0 : i32, i32
  }
  func.func @transform_5(%arg0: i32) -> (i32, i32) {
    %c0_i32 = arith.constant 0 : i32
    %c0_i32_0 = arith.constant 0 : i32
    %c0_i32_1 = arith.constant 0 : i32
    return %c0_i32, %c0_i32_0 : i32, i32
  }
  func.func @transform_6(%arg0: i32) -> (i32, i32, i32) {
    %c0_i32 = arith.constant 0 : i32
    %c0_i32_0 = arith.constant 0 : i32
    %c0_i32_1 = arith.constant 0 : i32
    return %arg0, %c0_i32, %c0_i32_0 : i32, i32, i32
  }
}

</mosaic_0001>

<bundles_post_ra>
// kernel: tpu_custom_call.1
= control target key start
LH: loop header
LB: loop body
LE: loop exit
PB: predicated region body
PF: predicated region fallthrough
CT: control target
= control target key end

     0   :  { %s3502_s21 = smov 0   ;;  %s4158_s0 = inlined_call_operand.vmem [shape: f32[2,64,32], index: 0, kind: input, shape index: {}]   ;;  %s4159_s1 = inlined_call_operand.vmem [shape: f32[64,32], index: 1, kind: input, shape index: {}]   ;;  %s4160_s2 = inlined_call_operand.vmem [shape: f32[32,96], index: 2, kind: input, shape index: {}]   ;;  %s4161_s3 = inlined_call_operand.vmem [shape: f32[1,96], index: 3, kind: input, shape index: {}]   ;;  %s4162_s4 = inlined_call_operand.vmem [shape: f32[32,32], index: 4, kind: input, shape index: {}]   ;;  %s4163_s5 = inlined_call_operand.vmem [shape: f32[1,32], index: 5, kind: input, shape index: {}]   ;;  %s4164_s6 = inlined_call_operand.vmem [shape: f32[2,64,32], index: 6, kind: output, shape index: {}]  }
   0x1 LB: > { %s2408_s22 = sadd.s32 4294967295, %s3451_s21   ;;  %p2412_p0 = scmp.ge.s32.totalorder %s3451_s21, 1  ;;  %s3451_s21 = sphi %s3502_s21, %s16_s21  }
   0x2   : > { %p212_p1 = scmp.lt.s32.totalorder %s3451_s21, 3 }
   0x4   : > { %p213_p2 = pnand %p2412_p0, %p212_p1 }
   0x5   : > { %v276_v0 = vld [vmem:[%s4160_s2] sm:$0xff] (!%p213_p2)  ;;  %v277_v1 = vld [vmem:[%s4160_s2 + $0x8] sm:$0xff] (!%p213_p2)  ;;  %v278_v2 = vld [vmem:[%s4160_s2 + $0x10] sm:$0xff] (!%p213_p2)  ;;  %p242_p3 = scmp.lt.s32.totalorder (!%p213_p2), %s2408_s22, 1  ;;  %vm287_vm0 = vcmask (!%p213_p2), 261120   ;;  %vm441_vm1 = vcmask (!%p213_p2), 64512  }
   0x6   : > { %216 = sbr.rel (%p213_p2) target bundleno = 3461 (0xd85), region = 44  ;;  %v2951_v3 = vpack.c.bf16 (!%p213_p2), %v277_v1, %v276_v0  ;;  %v279_v4 = vld [vmem:[%s4160_s2 + $0x18] sm:$0xff] (!%p213_p2)  ;;  %v260_v6 = vld [vmem:[%s4159_s1] sm:$0xff] (!%p213_p2)  ;;  %v261_v7 = vld [vmem:[%s4159_s1 + $0x8] sm:$0xff] (!%p213_p2)  ;;  %s3453_s8 = smov (!%p213_p2), 96   ;;  %vm587_vm3 = vcmask (!%p213_p2), 523264  }
   0x7   : > { %v2955_v5 = vpack.c.bf16 (!%p213_p2), %v279_v4, %v278_v2  ;;  %v262_v8 = vld [vmem:[%s4159_s1 + $0x10] sm:$0xff] (!%p213_p2)  ;;  %v263_v16 = vld [vmem:[%s4159_s1 + $0x18] sm:$0xff] (!%p213_p2)  ;;  %v264_v18 = vld [vmem:[%s4159_s1 + $0x20] sm:$0xff] (!%p213_p2)  ;;  %s3454_s9 = smov (!%p213_p2), 64   ;;  %s3455_s10 = smov (!%p213_p2), 88   ;;  %vm2187_vm4 = vcmask (!%p213_p2), 130048  }
   0x8   : > { %2952 = vmatprep.subr.bf16.mxu0 (!%p213_p2), %v2951_v3  ;;  %v265_v22 = vld [vmem:[%s4159_s1 + $0x28] sm:$0xff] (!%p213_p2)  ;;  %v266_v24 = vld [vmem:[%s4159_s1 + $0x30] sm:$0xff] (!%p213_p2)  ;;  %v267_v28 = vld [vmem:[%s4159_s1 + $0x38] sm:$0xff] (!%p213_p2)  ;;  %s3456_s11 = smov (!%p213_p2), 120   ;;  %s3457_s12 = smov (!%p213_p2), 56   ;;  %vm2196_vm5 = vcmask (!%p213_p2), 195584  }
   0x9   : > { %2954 = vmatpush3.bf16.msra.mxu0 (!%p213_p2), %v2951_v3  ;;  %v2417_v30 = vld [vmem:[%s4161_s3] ss:$0 sm:$0xff] (!%p213_p2)  ;;  %vm3605_vm2 = vmpackc.low (!%p213_p2), %vm441_vm1, %vm441_vm1  ;;  %s3458_s13 = smov (!%p213_p2), 80   ;;  %s3460_s15 = smov (!%p213_p2), 48  }
   0xa   : > { %2956 = vmatprep.subr.bf16.mxu0 (!%p213_p2), %v2955_v5  ;;  %s3461_s16 = smov (!%p213_p2), 72   ;;  %s3462_s17 = smov (!%p213_p2), 104  }
   0xb   : > { %s3463_s18 = smov (!%p213_p2), 40   ;;  %s3464_s19 = smov (!%p213_p2), 8  }
   0xc   : > { %s3465_s20 = smov (!%p213_p2), 16  }
   0xd   : > { %s4168_s22 = smov (!%p242_p3, %s2408_s22), 1  ;;  %2958 = vmatpush3.bf16.msra.mxu0 %v2955_v5 }
   0xe   : > { %s2533_s7 = sshll.u32 %s4168_s22, 6 }
   0xf   : > { %s246_s14 = scalar_lea.vmem %s4158_s0, %s2533_s7 }
  0x10   : > { %v252_v9 = vld [vmem:[%s246_s14] sm:$0xff]  ;;  %v253_v10 = vld [vmem:[%s246_s14 + $0x8] sm:$0xff]  ;;  %v254_v11 = vld [vmem:[%s246_s14 + $0x10] sm:$0xff] }
  0x11   : > { %v268_v12 = vadd.f32 %v260_v6, %v252_v9  ;;  %v269_v13 = vadd.f32 %v261_v7, %v253_v10  ;;  %v270_v14 = vadd.f32 %v262_v8, %v254_v11  ;;  %v255_v15 = vld [vmem:[%s246_s14 + $0x18] sm:$0xff]  ;;  %v256_v17 = vld [vmem:[%s246_s14 + $0x20] sm:$0xff]  ;;  %v257_v21 = vld [vmem:[%s246_s14 + $0x28] sm:$0xff] }
  0x12   : > { %v271_v19 = vadd.f32 %v263_v16, %v255_v15  ;;  %v272_v20 = vadd.f32 %v264_v18, %v256_v17  ;;  %v258_v23 = vld [vmem:[%s246_s14 + $0x30] sm:$0xff]  ;;  %v273_v25 = vadd.f32 %v265_v22, %v257_v21  ;;  %v259_v27 = vld [vmem:[%s246_s14 + $0x38] sm:$0xff]  ;;  %s3459_s14 = smov 112  }
  0x13   : > { %2695 = vmatprep.mubr.msk.f32.mxu0 %vm287_vm0, %v268_v12  ;;  %v274_v26 = vadd.f32 %v266_v24, %v258_v23  ;;  %v275_v29 = vadd.f32 %v267_v28, %v259_v27 }
  0x14   : > { %2696 = vmatmul.mubr.msk.f32.vlgmr.msra.gmra.mrb[0].mxu0 %vm287_vm0, %v269_v13 }
  0x15   : > { %2698 = vmatprep.mubr.msk.f32.mxu0 %vm287_vm0, %v270_v14 }
  0x18   : > { %2699 = vmatmul.mubr.msk.f32.gmra.mrb[2].mxu0 %vm287_vm0, %v271_v19 }
  0x19   : > { %2701 = vmatprep.mubr.msk.f32.mxu0 %vm287_vm0, %v272_v20 }
  0x1c   : > { %2702 = vmatmul.mubr.msk.f32.gmra.mrb[4].mxu0 %vm287_vm0, %v273_v25 }
  0x1d   : > { %2704 = vmatprep.mubr.msk.f32.mxu0 %vm287_vm0, %v274_v26 }
  0x20   : > { %2705 = vmatmul.mubr.msk.f32.gmra.mrb[6].mxu0 %vm287_vm0, %v275_v29 }
  0xe7   : > { %v2697_v31 = vpop.f32.mrb[0].mxu0 }
  0xe8   : > { %v3565_v32 = vadd.f32 %v2697_v31, %v2417_v30  ;;  %v378_v33 = vpop.f32.mrb[1].mxu0 }
  0xe9   : > { %v3567_v34 = vadd.f32 %v2417_v30, %v378_v33 }
  0xeb   : > { %2723 = vmatprep.mubr.msk.f32.mxu1 %vm441_vm1, %v3567_v34  ;;  %v3573_v35 = vpack.i.bf16 %v3565_v32, %v3567_v34  ;;  %v2700_v36 = vpop.f32.mrb[2].mxu0 }
  0xec   : > { %v3575_v37 = vadd.f32 %v2700_v36, %v2417_v30  ;;  %v388_v38 = vpop.f32.mrb[3].mxu0 }
  0xed   : > { %3158 = vrot.lane.b32.xlu0 %v3573_v35, %s3453_s8  ;;  %v3578_v39 = vadd.f32 %v2417_v30, %v388_v38 }
  0xef   : > { %v3582_v40 = vpack.i.bf16 %v3575_v37, %v3578_v39  ;;  %v2703_v41 = vpop.f32.mrb[4].mxu0 }
  0xf0   : > { %v3584_v42 = vadd.f32 %v2703_v41, %v2417_v30  ;;  %v398_v43 = vpop.f32.mrb[5].mxu0 }
  0xf1   : > { %3163 = vrot.lane.b32.xlu0 %v3582_v40, %s3453_s8  ;;  %v3587_v44 = vadd.f32 %v2417_v30, %v398_v43 }
  0xf3   : > { %v3591_v45 = vpack.i.bf16 %v3584_v42, %v3587_v44  ;;  %v2706_v46 = vpop.f32.mrb[6].mxu0 }
  0xf4   : > { %v3593_v47 = vadd.f32 %v2706_v46, %v2417_v30  ;;  %v408_v48 = vpop.f32.mrb[7].mxu0 }
  0xf5   : > { %3168 = vrot.lane.b32.xlu1 %v3591_v45, %s3453_s8  ;;  %v3596_v49 = vadd.f32 %v2417_v30, %v408_v48 }
  0xf7   : > { %v3600_v50 = vpack.i.bf16 %v3593_v47, %v3596_v49 }
  0xf9   : > { %3173 = vrot.lane.b32.xlu1 %v3600_v50, %s3453_s8  ;;  %s3466_s8 = smov 24  }
 0x15f   : > { %v3159_v51 = vpop.permute.xlu0 %3158 }
 0x160   : > { %v3161_v52 = vunpack.i.h.bf16 %v3159_v51  ;;  %v3160_v53 = vunpack.i.l.bf16 %v3159_v51 }
 0x162   : > { %v2959_v55 = vpack.c.bf16 %v3161_v52, %v3160_v53 }
 0x163   : > { %v3164_v56 = vpop.permute.xlu0 %3163 }
 0x164   : > { %2961 = vmatprep.subr.msk.bf16.mxu1 %vm3605_vm2, %v2959_v55  ;;  %v3166_v57 = vunpack.i.h.bf16 %v3164_v56  ;;  %v3165_v58 = vunpack.i.l.bf16 %v3164_v56 }
 0x165   : > { %2964 = vmatpush3.bf16.xpose.msk.msra.mxu1 %vm3605_vm2, %v2959_v55 }
 0x166   : > { %v2965_v59 = vpack.c.bf16 %v3166_v57, %v3165_v58 }
 0x167   : > { %v3169_v60 = vpop.permute.xlu1 %3168 }
 0x168   : > { %2967 = vmatprep.subr.msk.bf16.mxu1 %vm3605_vm2, %v2965_v59  ;;  %v3171_v61 = vunpack.i.h.bf16 %v3169_v60  ;;  %v3170_v62 = vunpack.i.l.bf16 %v3169_v60 }
 0x16a   : > { %v2971_v63 = vpack.c.bf16 %v3171_v61, %v3170_v62 }
 0x16b   : > { %v3174_v0 = vpop.permute.xlu1 %3173 }
 0x16c   : > { %v3176_v1 = vunpack.i.h.bf16 %v3174_v0  ;;  %v3175_v2 = vunpack.i.l.bf16 %v3174_v0 }
 0x16d   : > { %2970 = vmatpush3.bf16.xpose.msk.msra.mxu1 %vm3605_vm2, %v2965_v59 }
 0x16e   : > { %2973 = vmatprep.subr.msk.bf16.mxu1 %vm3605_vm2, %v2971_v63  ;;  %v2977_v3 = vpack.c.bf16 %v3176_v1, %v3175_v2 }
 0x175   : > { %2976 = vmatpush3.bf16.xpose.msk.msra.mxu1 %vm3605_vm2, %v2971_v63 }
 0x176   : > { %2979 = vmatprep.subr.msk.bf16.mxu1 %vm3605_vm2, %v2977_v3 }
 0x17d   : > { %2982 = vmatpush3.bf16.xpose.msk.msra.mxu1 %vm3605_vm2, %v2977_v3 }
 0x184   : > { %2724 = vmatmul.mubr.msk.f32.vlgmr.msra.gmra.mrb[0].mxu1 %vm441_vm1, %v3565_v32 }
 0x185   : > { %2726 = vmatprep.mubr.msk.f32.mxu1 %vm441_vm1, %v3578_v39 }
 0x188   : > { %2727 = vmatmul.mubr.msk.f32.gmra.mrb[2].mxu1 %vm441_vm1, %v3575_v37 }
 0x189   : > { %2729 = vmatprep.mubr.msk.f32.mxu1 %vm441_vm1, %v3587_v44 }
 0x18c   : > { %2730 = vmatmul.mubr.msk.f32.gmra.mrb[4].mxu1 %vm441_vm1, %v3584_v42 }
 0x18d   : > { %2732 = vmatprep.mubr.msk.f32.mxu1 %vm441_vm1, %v3596_v49 }
 0x190   : > { %2733 = vmatmul.mubr.msk.f32.gmra.mrb[6].mxu1 %vm441_vm1, %v3593_v47 }
 0x257   : > { %v2725_v4 = vpop.f32.mrb[0].mxu1 }
 0x258   : > { %v580_v5 = vmul.f32 0.35355338, %v2725_v4  ;;  %v540_v6 = vpop.f32.mrb[1].mxu1 }
 0x259   : > { %v579_v7 = vmul.f32 0.35355338, %v540_v6 }
 0x25a   : > { %v591_v8 = vsel %vm587_vm3, %v580_v5, -inf }
 0x25b   : > { %592 = vmax.xlane.f32.xlu1 %v591_v8  ;;  %v2728_v9 = vpop.f32.mrb[2].mxu1  ;;  %v588_v10 = vsel %vm587_vm3, %v579_v7, -inf }
 0x25c   : > { %v3641_v11 = vmul.f32 0.35355338, %v2728_v9  ;;  %589 = vmax.xlane.f32.xlu0 %v588_v10  ;;  %v550_v12 = vpop.f32.mrb[3].mxu1 }
 0x25d   : > { %v581_v14 = vmul.f32 0.35355338, %v550_v12 }
 0x25e   : > { %v597_v13 = vsel %vm587_vm3, %v3641_v11, -inf }
 0x25f   : > { %v2731_v15 = vpop.f32.mrb[4].mxu1  ;;  %v594_v19 = vsel %vm587_vm3, %v581_v14, -inf }
 0x260   : > { %598 = vmax.xlane.f32.xlu0 %v597_v13  ;;  %v560_v16 = vpop.f32.mrb[5].mxu1  ;;  %v584_v17 = vmul.f32 0.35355338, %v2731_v15 }
 0x261   : > { %v583_v24 = vmul.f32 0.35355338, %v560_v16 }
 0x262   : > { %v603_v22 = vsel %vm587_vm3, %v584_v17, -inf }
 0x263   : > { %v2734_v18 = vpop.f32.mrb[6].mxu1  ;;  %v600_v25 = vsel %vm587_vm3, %v583_v24, -inf }
 0x264   : > { %595 = vmax.xlane.f32.xlu0 %v594_v19  ;;  %v570_v20 = vpop.f32.mrb[7].mxu1  ;;  %v3646_v21 = vmul.f32 0.35355338, %v2734_v18 }
 0x265   : > { %v3655_v26 = vmul.f32 0.35355338, %v570_v20 }
 0x266   : > { %v609_v23 = vsel %vm587_vm3, %v3646_v21, -inf }
 0x267   : > { %v606_v27 = vsel %vm587_vm3, %v3655_v26, -inf }
 0x268   : > { %604 = vmax.xlane.f32.xlu0 %v603_v22 }
 0x26c   : > { %3178 = vrot.lane.b32.xlu1 %v3573_v35, %s3454_s9  ;;  %610 = vmax.xlane.f32.xlu0 %v609_v23 }
 0x282   : > { %3183 = vrot.lane.b32.xlu0 %v3582_v40, %s3454_s9 }
 0x290   : > { %601 = vmax.xlane.f32.xlu1 %v600_v25 }
 0x2a1   : > { %3188 = vrot.lane.b32.xlu1 %v3591_v45, %s3454_s9 }
 0x2c5   : > { %607 = vmax.xlane.f32.xlu1 %v606_v27 }
 0x2d6   : > { %3193 = vrot.lane.b32.xlu1 %v3600_v50, %s3454_s9 }
 0x2e8   : > { %v593_v28 = vpop.xlane.xlu1 %592 }
 0x2e9   : > { %v613_v29 = vsub.f32 %v580_v5, %v593_v28  ;;  %v590_v30 = vpop.xlane.xlu0 %589 }
 0x2ea   : > { %v612_v31 = vsub.f32 %v579_v7, %v590_v30 }
 0x2eb   : > { %v622_v33 = vmul.f32 1.442695, %v613_v29 }
 0x2ec   : > { %v620_v36 = vmul.f32 1.442695, %v612_v31  ;;  %v3179_v38 = vpop.permute.xlu1 %3178 }
 0x2ed   : > { %3317 = vpow2.f32 %v622_v33  ;;  %v3181_v41 = vunpack.i.h.bf16 %v3179_v38  ;;  %v3180_v43 = vunpack.i.l.bf16 %v3179_v38  ;;  %v599_v46 = vpop.xlane.xlu0 %598 }
 0x2ee   : > { %3319 = vpow2.f32 %v620_v36  ;;  %v615_v7 = vsub.f32 %v3641_v11, %v599_v46 }
 0x2ef   : > { %v2983_v48 = vpack.c.bf16 %v3181_v41, %v3180_v43 }
 0x2f0   : > { %v626_v9 = vmul.f32 1.442695, %v615_v7 }
 0x2f1   : > { %2984 = vmatprep.subr.bf16.mxu0 %v2983_v48  ;;  %v596_v51 = vpop.xlane.xlu0 %595 }
 0x2f2   : > { %v614_v52 = vsub.f32 %v581_v14, %v596_v51  ;;  %2986 = vmatpush3.bf16.msra.mxu0 %v2983_v48 }
 0x2f4   : > { %v624_v53 = vmul.f32 1.442695, %v614_v52 }
 0x2f5   : > { %v605_v55 = vpop.xlane.xlu0 %604 }
 0x2f6   : > { %3321 = vpow2.f32 %v624_v53  ;;  %v617_v56 = vsub.f32 %v584_v17, %v605_v55 }
 0x2f7   : > { %v3660_v57 = vpop.eup %3317 }
 0x2f8   : > { %v3662_v58 = vpop.eup %3319  ;;  %v630_v59 = vmul.f32 1.442695, %v617_v56  ;;  %v639_v60 = vsel %vm587_vm3, %v3660_v57, 0.0 }
 0x2f9   : > { %640 = vadd.xlane.f32.xlu0 %v639_v60  ;;  %v611_v61 = vpop.xlane.xlu0 %610  ;;  %v636_v62 = vsel %vm587_vm3, %v3662_v58, 0.0 }
 0x2fa   : > { %3323 = vpow2.f32 %v630_v59  ;;  %637 = vadd.xlane.f32.xlu1 %v636_v62  ;;  %v619_v8 = vsub.f32 %v3646_v21, %v611_v61 }
 0x2fb   : > { %3325 = vpow2.f32 %v626_v9 }
 0x2fc   : > { %v634_v13 = vmul.f32 1.442695, %v619_v8 }
 0x2fd   : > { %v3184_v63 = vpop.permute.xlu0 %3183 }
 0x2fe   : > { %v3186_v0 = vunpack.i.h.bf16 %v3184_v63  ;;  %v3185_v1 = vunpack.i.l.bf16 %v3184_v63 }
 0x300   : > { %v3668_v2 = vpop.eup %3321  ;;  %v2987_v3 = vpack.c.bf16 %v3186_v0, %v3185_v1 }
 0x301   : > { %v642_v4 = vsel %vm587_vm3, %v3668_v2, 0.0 }
 0x302   : > { %643 = vadd.xlane.f32.xlu0 %v642_v4  ;;  %2988 = vmatprep.subr.bf16.mxu0 %v2987_v3 }
 0x303   : > { %2990 = vmatpush3.bf16.msra.mxu0 %v2987_v3 }
 0x304   : > { %v3672_v5 = vpop.eup %3323 }
 0x305   : > { %v651_v6 = vsel %vm587_vm3, %v3672_v5, 0.0  ;;  %v3680_v19 = vpop.eup %3325 }
 0x306   : > { %652 = vadd.xlane.f32.xlu0 %v651_v6  ;;  %v645_v22 = vsel %vm587_vm3, %v3680_v19, 0.0 }
 0x30b   : > { %3198 = vrot.lane.b32.xlu1 %v3573_v35, %s3455_s10 }
 0x31d   : > { %v602_v10 = vpop.xlane.xlu1 %601 }
 0x31e   : > { %v616_v12 = vsub.f32 %v583_v24, %v602_v10 }
 0x320   : > { %v628_v14 = vmul.f32 1.442695, %v616_v12 }
 0x321   : > { %v3189_v15 = vpop.permute.xlu1 %3188 }
 0x322   : > { %3327 = vpow2.f32 %v628_v14  ;;  %v3191_v16 = vunpack.i.h.bf16 %v3189_v15  ;;  %v3190_v17 = vunpack.i.l.bf16 %v3189_v15 }
 0x323   : > { %3329 = vpow2.f32 %v634_v13 }
 0x324   : > { %v2991_v18 = vpack.c.bf16 %v3191_v16, %v3190_v17 }
 0x326   : > { %2992 = vmatprep.subr.bf16.mxu0 %v2991_v18 }
 0x327   : > { %2994 = vmatpush3.bf16.msra.mxu0 %v2991_v18 }
 0x32c   : > { %v3682_v20 = vpop.eup %3327 }
 0x32d   : > { %v648_v11 = vsel %vm587_vm3, %v3682_v20, 0.0  ;;  %v3686_v21 = vpop.eup %3329 }
 0x32e   : > { %649 = vadd.xlane.f32.xlu0 %v648_v11  ;;  %v657_v23 = vsel %vm587_vm3, %v3686_v21, 0.0 }
 0x32f   : > { %646 = vadd.xlane.f32.xlu1 %v645_v22 }
 0x332   : > { %658 = vadd.xlane.f32.xlu0 %v657_v23 }
 0x340   : > { %3208 = vrot.lane.b32.xlu1 %v3591_v45, %s3455_s10 }
 0x344   : > { %3213 = vrot.lane.b32.xlu1 %v3600_v50, %s3455_s10 }
 0x348   : > { %829 = vrot.lane.b32.xlu1 %v3567_v34, %s3456_s11 }
 0x34c   : > { %831 = vrot.lane.b32.xlu1 %v3565_v32, %s3456_s11 }
 0x350   : > { %835 = vrot.lane.b32.xlu1 %v3575_v37, %s3456_s11 }
 0x352   : > { %v608_v24 = vpop.xlane.xlu1 %607 }
 0x353   : > { %v618_v25 = vsub.f32 %v3655_v26, %v608_v24 }
 0x354   : > { %839 = vrot.lane.b32.xlu1 %v3584_v42, %s3456_s11 }
 0x355   : > { %v632_v27 = vmul.f32 1.442695, %v618_v25 }
 0x356   : > { %v3194_v28 = vpop.permute.xlu1 %3193 }
 0x357   : > { %3331 = vpow2.f32 %v632_v27  ;;  %v3196_v29 = vunpack.i.h.bf16 %v3194_v28  ;;  %v3195_v30 = vunpack.i.l.bf16 %v3194_v28 }
 0x358   : > { %843 = vrot.lane.b32.xlu1 %v3593_v47, %s3456_s11 }
 0x359   : > { %v2995_v31 = vpack.c.bf16 %v3196_v29, %v3195_v30 }
 0x35b   : > { %2996 = vmatprep.subr.bf16.mxu0 %v2995_v31 }
 0x35c   : > { %2998 = vmatpush3.bf16.msra.mxu0 %v2995_v31 }
 0x361   : > { %v3332_v33 = vpop.eup %3331 }
 0x362   : > { %v654_v36 = vsel %vm587_vm3, %v3332_v33, 0.0 }
 0x363   : > { %655 = vadd.xlane.f32.xlu0 %v654_v36 }
 0x379   : > { %3203 = vrot.lane.b32.xlu0 %v3582_v40, %s3455_s10 }
 0x37d   : > { %833 = vrot.lane.b32.xlu0 %v3578_v39, %s3456_s11 }
 0x381   : > { %837 = vrot.lane.b32.xlu0 %v3587_v44, %s3456_s11 }
 0x385   : > { %841 = vrot.lane.b32.xlu0 %v3596_v49, %s3456_s11 }
 0x386   : > { %v641_v26 = vpop.xlane.xlu0 %640 }
 0x387   : > { %3333 = vrcp.f32 %v641_v26  ;;  %v638_v38 = vpop.xlane.xlu1 %637 }
 0x388   : > { %3335 = vrcp.f32 %v638_v38 }
 0x38b   : > { %v3199_v41 = vpop.permute.xlu1 %3198 }
 0x38c   : > { %v3201_v43 = vunpack.i.h.bf16 %v3199_v41  ;;  %v3200_v46 = vunpack.i.l.bf16 %v3199_v41 }
 0x38e   : > { %v2999_v48 = vpack.c.bf16 %v3201_v43, %v3200_v46 }
 0x38f   : > { %v644_v51 = vpop.xlane.xlu0 %643 }
 0x390   : > { %3337 = vrcp.f32 %v644_v51  ;;  %3001 = vmatprep.subr.msk.bf16.mxu0 %vm3605_vm2, %v2999_v48 }
 0x391   : > { %v3334_v52 = vpop.eup %3333 }
 0x392   : > { %v3336_v53 = vpop.eup %3335  ;;  %v669_v56 = vmul.f32 %v3334_v52, %v3660_v57 }
 0x393   : > { %v668_v55 = vmul.f32 %v3336_v53, %v3662_v58  ;;  %v653_v61 = vpop.xlane.xlu0 %652 }
 0x395   : > { %2751 = vmatprep.mubr.msk.f32.mxu0 %vm587_vm3, %v668_v55 }
 0x396   : > { %2752 = vmatmul.mubr.msk.f32.vlgmr.msra.gmra.mrb[8].mxu0 %vm587_vm3, %v669_v56 }
 0x397   : > { %3004 = vmatpush3.bf16.xpose.msk.msra.mxu0 %vm3605_vm2, %v2999_v48 }
 0x39a   : > { %v3338_v59 = vpop.eup %3337 }
 0x39b   : > { %v670_v60 = vmul.f32 %v3338_v59, %v3668_v2 }
 0x39d   : > { %2754 = vmatprep.mubr.msk.f32.mxu0 %vm587_vm3, %v670_v60 }
 0x3bb   : > { %v650_v62 = vpop.xlane.xlu0 %649 }
 0x3bc   : > { %3339 = vrcp.f32 %v650_v62  ;;  %v647_v63 = vpop.xlane.xlu1 %646 }
 0x3bd   : > { %3341 = vrcp.f32 %v647_v63 }
 0x3be   : > { %3343 = vrcp.f32 %v653_v61 }
 0x3bf   : > { %v659_v4 = vpop.xlane.xlu0 %658 }
 0x3c0   : > { %3345 = vrcp.f32 %v659_v4  ;;  %v3209_v7 = vpop.permute.xlu1 %3208 }
 0x3c1   : > { %v3211_v9 = vunpack.i.h.bf16 %v3209_v7  ;;  %v3210_v10 = vunpack.i.l.bf16 %v3209_v7 }
 0x3c3   : > { %v3011_v15 = vpack.c.bf16 %v3211_v9, %v3210_v10 }
 0x3c4   : > { %v3214_v16 = vpop.permute.xlu1 %3213 }
 0x3c6   : > { %v3340_v58 = vpop.eup %3339 }
 0x3c7   : > { %v3342_v57 = vpop.eup %3341  ;;  %v672_v3 = vmul.f32 %v3340_v58, %v3682_v20  ;;  %v3215_v20 = vunpack.i.l.bf16 %v3214_v16 }
 0x3c8   : > { %v671_v0 = vmul.f32 %v3342_v57, %v3680_v19  ;;  %v3344_v1 = vpop.eup %3343  ;;  %v3216_v19 = vunpack.i.h.bf16 %v3214_v16  ;;  %v830_v22 = vpop.permute.xlu1 %829 }
 0x3c9   : > { %v673_v2 = vmul.f32 %v3344_v1, %v3672_v5 }
 0x3ca   : > { %2755 = vmatmul.mubr.msk.f32.gmra.mrb[10].mxu0 %vm587_vm3, %v671_v0  ;;  %v3346_v17 = vpop.eup %3345  ;;  %v3017_v23 = vpack.c.bf16 %v3216_v19, %v3215_v20 }
 0x3cb   : > { %2757 = vmatprep.mubr.msk.f32.mxu0 %vm587_vm3, %v672_v3  ;;  %v675_v11 = vmul.f32 %v3346_v17, %v3686_v21 }
 0x3cc   : > { %v832_v24 = vpop.permute.xlu1 %831 }
 0x3ce   : > { %2758 = vmatmul.mubr.msk.f32.gmra.mrb[12].mxu0 %vm587_vm3, %v673_v2 }
 0x3d0   : > { %v836_v21 = vpop.permute.xlu1 %835 }
 0x3d4   : > { %v840_v28 = vpop.permute.xlu1 %839 }
 0x3d8   : > { %v844_v30 = vpop.permute.xlu1 %843 }
 0x3f0   : > { %v656_v6 = vpop.xlane.xlu0 %655 }
 0x3f1   : > { %3347 = vrcp.f32 %v656_v6 }
 0x3f4   : > { %v3204_v8 = vpop.permute.xlu0 %3203 }
 0x3f5   : > { %v3206_v12 = vunpack.i.h.bf16 %v3204_v8  ;;  %v3205_v13 = vunpack.i.l.bf16 %v3204_v8 }
 0x3f7   : > { %v3005_v14 = vpack.c.bf16 %v3206_v12, %v3205_v13 }
 0x3f8   : > { %v834_v25 = vpop.permute.xlu0 %833 }
 0x3f9   : > { %3007 = vmatprep.subr.msk.bf16.mxu0 %vm3605_vm2, %v3005_v14 }
 0x3fa   : > { %3010 = vmatpush3.bf16.xpose.msk.msra.mxu0 %vm3605_vm2, %v3005_v14 }
 0x3fb   : > { %v3348_v5 = vpop.eup %3347  ;;  %3013 = vmatprep.subr.msk.bf16.mxu0 %vm3605_vm2, %v3011_v15 }
 0x3fc   : > { %v674_v18 = vmul.f32 %v3348_v5, %v3332_v33  ;;  %v838_v27 = vpop.permute.xlu0 %837 }
 0x3fe   : > { %2760 = vmatprep.mubr.msk.f32.mxu0 %vm587_vm3, %v674_v18 }
 0x3ff   : > { %2761 = vmatmul.mubr.msk.f32.gmra.mrb[14].mxu0 %vm587_vm3, %v675_v11 }
 0x400   : > { %2779 = vmatprep.mubr.msk.f32.mxu0 %vm441_vm1, %v830_v22  ;;  %v842_v29 = vpop.permute.xlu0 %841 }
 0x402   : > { %3016 = vmatpush3.bf16.xpose.msk.msra.mxu0 %vm3605_vm2, %v3011_v15 }
 0x403   : > { %3019 = vmatprep.subr.msk.bf16.mxu0 %vm3605_vm2, %v3017_v23 }
 0x40a   : > { %3022 = vmatpush3.bf16.xpose.msk.msra.mxu0 %vm3605_vm2, %v3017_v23 }
 0x411   : > { %2780 = vmatmul.mubr.msk.f32.vlgmr.msra.gmra.mrb[16].mxu0 %vm441_vm1, %v832_v24 }
 0x412   : > { %2782 = vmatprep.mubr.msk.f32.mxu0 %vm441_vm1, %v834_v25 }
 0x415   : > { %2783 = vmatmul.mubr.msk.f32.gmra.mrb[18].mxu0 %vm441_vm1, %v836_v21 }
 0x416   : > { %2785 = vmatprep.mubr.msk.f32.mxu0 %vm441_vm1, %v838_v27 }
 0x419   : > { %2786 = vmatmul.mubr.msk.f32.gmra.mrb[20].mxu0 %vm441_vm1, %v840_v28 }
 0x41a   : > { %2788 = vmatprep.mubr.msk.f32.mxu0 %vm441_vm1, %v842_v29 }
 0x41d   : > { %2789 = vmatmul.mubr.msk.f32.gmra.mrb[22].mxu0 %vm441_vm1, %v844_v30 }
 0x469   : > { %v3747_v31 = vpop.f32.mrb[8].mxu0 }
 0x46a   : > { %v3749_v33 = vpop.f32.mrb[9].mxu0 }
 0x49d   : > { %v3751_v36 = vpop.f32.mrb[10].mxu0 }
 0x49e   : > { %v3753_v26 = vpop.f32.mrb[11].mxu0 }
 0x4a1   : > { %v3755_v38 = vpop.f32.mrb[12].mxu0 }
 0x4a2   : > { %v3757_v41 = vpop.f32.mrb[13].mxu0 }
 0x4d2   : > { %v3759_v43 = vpop.f32.mrb[14].mxu0 }
 0x4d3   : > { %v3761_v46 = vpop.f32.mrb[15].mxu0 }
 0x4e4   : > { %v2781_v48 = vpop.f32.mrb[16].mxu0 }
 0x4e5   : > { %v999_v51 = vmul.f32 0.35355338, %v2781_v48  ;;  %v959_v52 = vpop.f32.mrb[17].mxu0 }
 0x4e6   : > { %v998_v53 = vmul.f32 0.35355338, %v959_v52 }
 0x4e7   : > { %v1009_v55 = vsel %vm587_vm3, %v999_v51, -inf }
 0x4e8   : > { %1010 = vmax.xlane.f32.xlu1 %v1009_v55  ;;  %v2784_v56 = vpop.f32.mrb[18].mxu0  ;;  %v1006_v59 = vsel %vm587_vm3, %v998_v53, -inf }
 0x4e9   : > { %v3765_v60 = vmul.f32 0.35355338, %v2784_v56  ;;  %1007 = vmax.xlane.f32.xlu0 %v1006_v59  ;;  %v969_v61 = vpop.f32.mrb[19].mxu0 }
 0x4ea   : > { %v1000_v63 = vmul.f32 0.35355338, %v969_v61 }
 0x4eb   : > { %v1015_v62 = vsel %vm587_vm3, %v3765_v60, -inf }
 0x4ec   : > { %v2787_v58 = vpop.f32.mrb[20].mxu0  ;;  %v1012_v3 = vsel %vm587_vm3, %v1000_v63, -inf }
 0x4ed   : > { %1016 = vmax.xlane.f32.xlu0 %v1015_v62  ;;  %v979_v57 = vpop.f32.mrb[21].mxu0  ;;  %v1003_v0 = vmul.f32 0.35355338, %v2787_v58 }
 0x4ee   : > { %v1002_v8 = vmul.f32 0.35355338, %v979_v57 }
 0x4ef   : > { %v1021_v6 = vsel %vm587_vm3, %v1003_v0, -inf }
 0x4f0   : > { %v2790_v1 = vpop.f32.mrb[22].mxu0  ;;  %v1018_v9 = vsel %vm587_vm3, %v1002_v8, -inf }
 0x4f1   : > { %1013 = vmax.xlane.f32.xlu0 %v1012_v3  ;;  %v989_v2 = vpop.f32.mrb[23].mxu0  ;;  %v3770_v4 = vmul.f32 0.35355338, %v2790_v1 }
 0x4f2   : > { %v3779_v10 = vmul.f32 0.35355338, %v989_v2 }
 0x4f3   : > { %v1027_v7 = vsel %vm587_vm3, %v3770_v4, -inf }
 0x4f4   : > { %v1024_v12 = vsel %vm587_vm3, %v3779_v10, -inf }
 0x4f5   : > { %1022 = vmax.xlane.f32.xlu0 %v1021_v6 }
 0x4f9   : > { %3218 = vrot.lane.b32.xlu1 %v3573_v35, %s3457_s12  ;;  %1028 = vmax.xlane.f32.xlu0 %v1027_v7 }
 0x50f   : > { %3223 = vrot.lane.b32.xlu0 %v3582_v40, %s3457_s12 }
 0x51d   : > { %1019 = vmax.xlane.f32.xlu1 %v1018_v9 }
 0x52e   : > { %3228 = vrot.lane.b32.xlu1 %v3591_v45, %s3457_s12 }
 0x552   : > { %1025 = vmax.xlane.f32.xlu1 %v1024_v12 }
 0x563   : > { %3233 = vrot.lane.b32.xlu1 %v3600_v50, %s3457_s12 }
 0x575   : > { %v1011_v13 = vpop.xlane.xlu1 %1010 }
 0x576   : > { %v1031_v14 = vsub.f32 %v999_v51, %v1011_v13  ;;  %v1008_v15 = vpop.xlane.xlu0 %1007 }
 0x577   : > { %v1030_v16 = vsub.f32 %v998_v53, %v1008_v15 }
 0x578   : > { %v1040_v17 = vmul.f32 1.442695, %v1031_v14 }
 0x579   : > { %v1038_v5 = vmul.f32 1.442695, %v1030_v16  ;;  %v3219_v18 = vpop.permute.xlu1 %3218 }
 0x57a   : > { %3349 = vpow2.f32 %v1040_v17  ;;  %v3221_v19 = vunpack.i.h.bf16 %v3219_v18  ;;  %v3220_v20 = vunpack.i.l.bf16 %v3219_v18  ;;  %v1017_v11 = vpop.xlane.xlu0 %1016 }
 0x57b   : > { %3351 = vpow2.f32 %v1038_v5  ;;  %v1033_v57 = vsub.f32 %v3765_v60, %v1017_v11 }
 0x57c   : > { %v3023_v22 = vpack.c.bf16 %v3221_v19, %v3220_v20 }
 0x57d   : > { %v1044_v1 = vmul.f32 1.442695, %v1033_v57 }
 0x57e   : > { %3024 = vmatprep.subr.bf16.mxu1 %v3023_v22  ;;  %v1014_v23 = vpop.xlane.xlu0 %1013 }
 0x57f   : > { %v1032_v24 = vsub.f32 %v1000_v63, %v1014_v23  ;;  %3026 = vmatpush3.bf16.msra.mxu1 %v3023_v22 }
 0x581   : > { %v1042_v25 = vmul.f32 1.442695, %v1032_v24 }
 0x582   : > { %v1023_v21 = vpop.xlane.xlu0 %1022 }
 0x583   : > { %3353 = vpow2.f32 %v1042_v25  ;;  %v1035_v27 = vsub.f32 %v1003_v0, %v1023_v21 }
 0x584   : > { %v3784_v28 = vpop.eup %3349 }
 0x585   : > { %v3786_v29 = vpop.eup %3351  ;;  %v1048_v30 = vmul.f32 1.442695, %v1035_v27  ;;  %v1057_v48 = vsel %vm587_vm3, %v3784_v28, 0.0 }
 0x586   : > { %1058 = vadd.xlane.f32.xlu0 %v1057_v48  ;;  %v1029_v51 = vpop.xlane.xlu0 %1028  ;;  %v1054_v52 = vsel %vm587_vm3, %v3786_v29, 0.0 }
 0x587   : > { %3355 = vpow2.f32 %v1048_v30  ;;  %1055 = vadd.xlane.f32.xlu1 %v1054_v52  ;;  %v1037_v0 = vsub.f32 %v3770_v4, %v1029_v51 }
 0x588   : > { %3357 = vpow2.f32 %v1044_v1 }
 0x589   : > { %v1052_v6 = vmul.f32 1.442695, %v1037_v0 }
 0x58a   : > { %v3224_v53 = vpop.permute.xlu0 %3223 }
 0x58b   : > { %v3226_v55 = vunpack.i.h.bf16 %v3224_v53  ;;  %v3225_v56 = vunpack.i.l.bf16 %v3224_v53 }
 0x58d   : > { %v3792_v59 = vpop.eup %3353  ;;  %v3027_v61 = vpack.c.bf16 %v3226_v55, %v3225_v56 }
 0x58e   : > { %v1060_v62 = vsel %vm587_vm3, %v3792_v59, 0.0 }
 0x58f   : > { %1061 = vadd.xlane.f32.xlu0 %v1060_v62  ;;  %3028 = vmatprep.subr.bf16.mxu1 %v3027_v61 }
 0x590   : > { %3030 = vmatpush3.bf16.msra.mxu1 %v3027_v61 }
 0x591   : > { %v3796_v63 = vpop.eup %3355 }
 0x592   : > { %v1069_v58 = vsel %vm587_vm3, %v3796_v63, 0.0  ;;  %v3804_v15 = vpop.eup %3357 }
 0x593   : > { %1070 = vadd.xlane.f32.xlu0 %v1069_v58 }
 0x598   : > { %3238 = vrot.lane.b32.xlu1 %v3573_v35, %s3458_s13 }
 0x5aa   : > { %v1020_v3 = vpop.xlane.xlu1 %1019 }
 0x5ab   : > { %v1034_v2 = vsub.f32 %v1002_v8, %v1020_v3  ;;  %v1063_v8 = vsel %vm587_vm3, %v3804_v15, 0.0 }
 0x5ad   : > { %v1046_v7 = vmul.f32 1.442695, %v1034_v2 }
 0x5ae   : > { %v3229_v9 = vpop.permute.xlu1 %3228 }
 0x5af   : > { %3359 = vpow2.f32 %v1046_v7  ;;  %v3231_v12 = vunpack.i.h.bf16 %v3229_v9  ;;  %v3230_v13 = vunpack.i.l.bf16 %v3229_v9 }
 0x5b0   : > { %3361 = vpow2.f32 %v1052_v6 }
 0x5b1   : > { %v3031_v14 = vpack.c.bf16 %v3231_v12, %v3230_v13 }
 0x5b3   : > { %3032 = vmatprep.subr.bf16.mxu1 %v3031_v14 }
 0x5b4   : > { %3034 = vmatpush3.bf16.msra.mxu1 %v3031_v14 }
 0x5b9   : > { %v3806_v16 = vpop.eup %3359 }
 0x5ba   : > { %v1066_v60 = vsel %vm587_vm3, %v3806_v16, 0.0  ;;  %v3810_v4 = vpop.eup %3361 }
 0x5bb   : > { %1067 = vadd.xlane.f32.xlu0 %v1066_v60  ;;  %v1075_v17 = vsel %vm587_vm3, %v3810_v4, 0.0 }
 0x5bc   : > { %1064 = vadd.xlane.f32.xlu1 %v1063_v8 }
 0x5bf   : > { %1076 = vadd.xlane.f32.xlu0 %v1075_v17 }
 0x5cd   : > { %3248 = vrot.lane.b32.xlu1 %v3591_v45, %s3458_s13 }
 0x5d1   : > { %3253 = vrot.lane.b32.xlu1 %v3600_v50, %s3458_s13 }
 0x5d5   : > { %1247 = vrot.lane.b32.xlu1 %v3567_v34, %s3459_s14 }
 0x5d9   : > { %1249 = vrot.lane.b32.xlu1 %v3565_v32, %s3459_s14 }
 0x5dd   : > { %1253 = vrot.lane.b32.xlu1 %v3575_v37, %s3459_s14 }
 0x5df   : > { %v1026_v5 = vpop.xlane.xlu1 %1025 }
 0x5e0   : > { %v1036_v18 = vsub.f32 %v3779_v10, %v1026_v5 }
 0x5e1   : > { %1257 = vrot.lane.b32.xlu1 %v3584_v42, %s3459_s14 }
 0x5e2   : > { %v1050_v19 = vmul.f32 1.442695, %v1036_v18 }
 0x5e3   : > { %v3234_v20 = vpop.permute.xlu1 %3233 }
 0x5e4   : > { %3363 = vpow2.f32 %v1050_v19  ;;  %v3236_v11 = vunpack.i.h.bf16 %v3234_v20  ;;  %v3235_v22 = vunpack.i.l.bf16 %v3234_v20 }
 0x5e5   : > { %1261 = vrot.lane.b32.xlu1 %v3593_v47, %s3459_s14 }
 0x5e6   : > { %v3035_v23 = vpack.c.bf16 %v3236_v11, %v3235_v22 }
 0x5e8   : > { %3036 = vmatprep.subr.bf16.mxu1 %v3035_v23 }
 0x5e9   : > { %3038 = vmatpush3.bf16.msra.mxu1 %v3035_v23 }
 0x5ee   : > { %v3364_v24 = vpop.eup %3363 }
 0x5ef   : > { %v1072_v25 = vsel %vm587_vm3, %v3364_v24, 0.0 }
 0x5f0   : > { %1073 = vadd.xlane.f32.xlu0 %v1072_v25 }
 0x606   : > { %3243 = vrot.lane.b32.xlu0 %v3582_v40, %s3458_s13  ;;  %s251_s13 = scalar_lea.vmem %s4164_s6, %s2533_s7 }
 0x60a   : > { %1251 = vrot.lane.b32.xlu0 %v3578_v39, %s3459_s14 }
 0x60e   : > { %1255 = vrot.lane.b32.xlu0 %v3587_v44, %s3459_s14 }
 0x612   : > { %1259 = vrot.lane.b32.xlu0 %v3596_v49, %s3459_s14 }
 0x613   : > { %v1059_v10 = vpop.xlane.xlu0 %1058 }
 0x614   : > { %3365 = vrcp.f32 %v1059_v10  ;;  %v1056_v21 = vpop.xlane.xlu1 %1055 }
 0x615   : > { %3367 = vrcp.f32 %v1056_v21 }
 0x618   : > { %v3239_v27 = vpop.permute.xlu1 %3238 }
 0x619   : > { %v3241_v30 = vunpack.i.h.bf16 %v3239_v27  ;;  %v3240_v48 = vunpack.i.l.bf16 %v3239_v27 }
 0x61b   : > { %v3039_v51 = vpack.c.bf16 %v3241_v30, %v3240_v48 }
 0x61c   : > { %v1062_v52 = vpop.xlane.xlu0 %1061 }
 0x61d   : > { %3369 = vrcp.f32 %v1062_v52  ;;  %3041 = vmatprep.subr.msk.bf16.mxu1 %vm3605_vm2, %v3039_v51 }
 0x61e   : > { %v3366_v53 = vpop.eup %3365 }
 0x61f   : > { %v3368_v55 = vpop.eup %3367  ;;  %v1087_v61 = vmul.f32 %v3366_v53, %v3784_v28 }
 0x620   : > { %v1086_v56 = vmul.f32 %v3368_v55, %v3786_v29  ;;  %v1071_v57 = vpop.xlane.xlu0 %1070 }
 0x622   : > { %2807 = vmatprep.mubr.msk.f32.mxu1 %vm587_vm3, %v1086_v56 }
 0x623   : > { %2808 = vmatmul.mubr.msk.f32.vlgmr.msra.gmra.mrb[8].mxu1 %vm587_vm3, %v1087_v61 }
 0x624   : > { %3044 = vmatpush3.bf16.xpose.msk.msra.mxu1 %vm3605_vm2, %v3039_v51 }
 0x627   : > { %v3370_v62 = vpop.eup %3369 }
 0x628   : > { %v1088_v58 = vmul.f32 %v3370_v62, %v3792_v59 }
 0x62a   : > { %2810 = vmatprep.mubr.msk.f32.mxu1 %vm587_vm3, %v1088_v58 }
 0x648   : > { %v1068_v0 = vpop.xlane.xlu0 %1067 }
 0x649   : > { %3371 = vrcp.f32 %v1068_v0  ;;  %v1065_v1 = vpop.xlane.xlu1 %1064 }
 0x64a   : > { %3373 = vrcp.f32 %v1065_v1 }
 0x64b   : > { %3375 = vrcp.f32 %v1071_v57 }
 0x64c   : > { %v1077_v7 = vpop.xlane.xlu0 %1076 }
 0x64d   : > { %3377 = vrcp.f32 %v1077_v7  ;;  %v3249_v12 = vpop.permute.xlu1 %3248 }
 0x64e   : > { %v3251_v14 = vunpack.i.h.bf16 %v3249_v12  ;;  %v3250_v60 = vunpack.i.l.bf16 %v3249_v12 }
 0x651   : > { %v3254_v5 = vpop.permute.xlu1 %3253 }
 0x652   : > { %v3256_v20 = vunpack.i.h.bf16 %v3254_v5  ;;  %v3255_v11 = vunpack.i.l.bf16 %v3254_v5 }
 0x653   : > { %v3372_v29 = vpop.eup %3371 }
 0x654   : > { %v3374_v28 = vpop.eup %3373  ;;  %v1090_v6 = vmul.f32 %v3372_v29, %v3806_v16  ;;  %v3051_v16 = vpack.c.bf16 %v3251_v14, %v3250_v60  ;;  %v3057_v25 = vpack.c.bf16 %v3256_v20, %v3255_v11 }
 0x655   : > { %v1089_v3 = vmul.f32 %v3374_v28, %v3804_v15  ;;  %v3376_v2 = vpop.eup %3375  ;;  %v1248_v23 = vpop.permute.xlu1 %1247 }
 0x656   : > { %v1091_v59 = vmul.f32 %v3376_v2, %v3796_v63 }
 0x657   : > { %2811 = vmatmul.mubr.msk.f32.gmra.mrb[10].mxu1 %vm587_vm3, %v1089_v3  ;;  %v3378_v18 = vpop.eup %3377 }
 0x658   : > { %2813 = vmatprep.mubr.msk.f32.mxu1 %vm587_vm3, %v1090_v6  ;;  %v1093_v22 = vmul.f32 %v3378_v18, %v3810_v4 }
 0x659   : > { %v1250_v10 = vpop.permute.xlu1 %1249 }
 0x65b   : > { %2814 = vmatmul.mubr.msk.f32.gmra.mrb[12].mxu1 %vm587_vm3, %v1091_v59 }
 0x65d   : > { %v1254_v4 = vpop.permute.xlu1 %1253 }
 0x661   : > { %v1258_v27 = vpop.permute.xlu1 %1257 }
 0x665   : > { %v1262_v48 = vpop.permute.xlu1 %1261 }
 0x67d   : > { %v1074_v9 = vpop.xlane.xlu0 %1073 }
 0x67e   : > { %3379 = vrcp.f32 %v1074_v9 }
 0x681   : > { %v3244_v13 = vpop.permute.xlu0 %3243 }
 0x682   : > { %v3246_v15 = vunpack.i.h.bf16 %v3244_v13  ;;  %v3245_v8 = vunpack.i.l.bf16 %v3244_v13 }
 0x684   : > { %v3045_v17 = vpack.c.bf16 %v3246_v15, %v3245_v8 }
 0x686   : > { %3047 = vmatprep.subr.msk.bf16.mxu1 %vm3605_vm2, %v3045_v17 }
 0x687   : > { %3050 = vmatpush3.bf16.xpose.msk.msra.mxu1 %vm3605_vm2, %v3045_v17 }
 0x688   : > { %v3380_v63 = vpop.eup %3379  ;;  %3053 = vmatprep.subr.msk.bf16.mxu1 %vm3605_vm2, %v3051_v16 }
 0x689   : > { %v1092_v19 = vmul.f32 %v3380_v63, %v3364_v24  ;;  %v1252_v24 = vpop.permute.xlu0 %1251 }
 0x68b   : > { %2816 = vmatprep.mubr.msk.f32.mxu1 %vm587_vm3, %v1092_v19 }
 0x68c   : > { %2817 = vmatmul.mubr.msk.f32.gmra.mrb[14].mxu1 %vm587_vm3, %v1093_v22 }
 0x68d   : > { %2835 = vmatprep.mubr.msk.f32.mxu1 %vm441_vm1, %v1248_v23  ;;  %v1256_v21 = vpop.permute.xlu0 %1255 }
 0x68f   : > { %3056 = vmatpush3.bf16.xpose.msk.msra.mxu1 %vm3605_vm2, %v3051_v16 }
 0x690   : > { %3059 = vmatprep.subr.msk.bf16.mxu1 %vm3605_vm2, %v3057_v25 }
 0x691   : > { %v1260_v30 = vpop.permute.xlu0 %1259 }
 0x697   : > { %3062 = vmatpush3.bf16.xpose.msk.msra.mxu1 %vm3605_vm2, %v3057_v25 }
 0x69e   : > { %2836 = vmatmul.mubr.msk.f32.vlgmr.msra.gmra.mrb[16].mxu1 %vm441_vm1, %v1250_v10 }
 0x69f   : > { %2838 = vmatprep.mubr.msk.f32.mxu1 %vm441_vm1, %v1252_v24 }
 0x6a2   : > { %2839 = vmatmul.mubr.msk.f32.gmra.mrb[18].mxu1 %vm441_vm1, %v1254_v4 }
 0x6a3   : > { %2841 = vmatprep.mubr.msk.f32.mxu1 %vm441_vm1, %v1256_v21 }
 0x6a6   : > { %2842 = vmatmul.mubr.msk.f32.gmra.mrb[20].mxu1 %vm441_vm1, %v1258_v27 }
 0x6a7   : > { %2844 = vmatprep.mubr.msk.f32.mxu1 %vm441_vm1, %v1260_v30 }
 0x6aa   : > { %2845 = vmatmul.mubr.msk.f32.gmra.mrb[22].mxu1 %vm441_vm1, %v1262_v48 }
 0x6f6   : > { %v3871_v51 = vpop.f32.mrb[8].mxu1 }
 0x6f7   : > { %v3873_v52 = vpop.f32.mrb[9].mxu1 }
 0x72a   : > { %v3875_v53 = vpop.f32.mrb[10].mxu1 }
 0x72b   : > { %v3877_v55 = vpop.f32.mrb[11].mxu1 }
 0x72e   : > { %v3879_v56 = vpop.f32.mrb[12].mxu1 }
 0x72f   : > { %v3881_v61 = vpop.f32.mrb[13].mxu1 }
 0x75f   : > { %v3883_v62 = vpop.f32.mrb[14].mxu1 }
 0x760   : > { %v3885_v58 = vpop.f32.mrb[15].mxu1 }
 0x771   : > { %v2837_v57 = vpop.f32.mrb[16].mxu1 }
 0x772   : > { %v1417_v0 = vmul.f32 0.35355338, %v2837_v57  ;;  %v1377_v1 = vpop.f32.mrb[17].mxu1 }
 0x773   : > { %v1416_v29 = vmul.f32 0.35355338, %v1377_v1 }
 0x774   : > { %v1427_v28 = vsel %vm587_vm3, %v1417_v0, -inf }
 0x775   : > { %1428 = vmax.xlane.f32.xlu1 %v1427_v28  ;;  %v2840_v3 = vpop.f32.mrb[18].mxu1  ;;  %v1424_v2 = vsel %vm587_vm3, %v1416_v29, -inf }
 0x776   : > { %v3889_v6 = vmul.f32 0.35355338, %v2840_v3  ;;  %1425 = vmax.xlane.f32.xlu0 %v1424_v2  ;;  %v1387_v59 = vpop.f32.mrb[19].mxu1 }
 0x777   : > { %v1418_v9 = vmul.f32 0.35355338, %v1387_v59 }
 0x778   : > { %v1433_v7 = vsel %vm587_vm3, %v3889_v6, -inf }
 0x779   : > { %v2843_v12 = vpop.f32.mrb[20].mxu1  ;;  %v1430_v15 = vsel %vm587_vm3, %v1418_v9, -inf }
 0x77a   : > { %1434 = vmax.xlane.f32.xlu0 %v1433_v7  ;;  %v1397_v13 = vpop.f32.mrb[21].mxu1  ;;  %v1421_v14 = vmul.f32 0.35355338, %v2843_v12 }
 0x77b   : > { %v1420_v18 = vmul.f32 0.35355338, %v1397_v13 }
 0x77c   : > { %v1439_v16 = vsel %vm587_vm3, %v1421_v14, -inf }
 0x77d   : > { %v2846_v60 = vpop.f32.mrb[22].mxu1  ;;  %v1436_v63 = vsel %vm587_vm3, %v1420_v18, -inf }
 0x77e   : > { %1431 = vmax.xlane.f32.xlu0 %v1430_v15  ;;  %v1407_v8 = vpop.f32.mrb[23].mxu1  ;;  %v3894_v17 = vmul.f32 0.35355338, %v2846_v60 }
 0x77f   : > { %v3903_v19 = vmul.f32 0.35355338, %v1407_v8 }
 0x780   : > { %v1445_v5 = vsel %vm587_vm3, %v3894_v17, -inf }
 0x781   : > { %v1442_v20 = vsel %vm587_vm3, %v3903_v19, -inf }
 0x782   : > { %1440 = vmax.xlane.f32.xlu0 %v1439_v16 }
 0x786   : > { %3258 = vrot.lane.b32.xlu1 %v3573_v35, %s3460_s15  ;;  %1446 = vmax.xlane.f32.xlu0 %v1445_v5 }
 0x79c   : > { %3263 = vrot.lane.b32.xlu0 %v3582_v40, %s3460_s15 }
 0x7aa   : > { %1437 = vmax.xlane.f32.xlu1 %v1436_v63 }
 0x7bb   : > { %3268 = vrot.lane.b32.xlu1 %v3591_v45, %s3460_s15 }
 0x7df   : > { %1443 = vmax.xlane.f32.xlu1 %v1442_v20 }
 0x7f0   : > { %3273 = vrot.lane.b32.xlu1 %v3600_v50, %s3460_s15 }
 0x802   : > { %v1429_v11 = vpop.xlane.xlu1 %1428 }
 0x803   : > { %v1449_v22 = vsub.f32 %v1417_v0, %v1429_v11  ;;  %v1426_v23 = vpop.xlane.xlu0 %1425 }
 0x804   : > { %v1448_v25 = vsub.f32 %v1416_v29, %v1426_v23 }
 0x805   : > { %v1458_v10 = vmul.f32 1.442695, %v1449_v22 }
 0x806   : > { %v1456_v24 = vmul.f32 1.442695, %v1448_v25  ;;  %v3259_v4 = vpop.permute.xlu1 %3258 }
 0x807   : > { %3381 = vpow2.f32 %v1458_v10  ;;  %v3261_v21 = vunpack.i.h.bf16 %v3259_v4  ;;  %v3260_v27 = vunpack.i.l.bf16 %v3259_v4  ;;  %v1435_v30 = vpop.xlane.xlu0 %1434 }
 0x808   : > { %3383 = vpow2.f32 %v1456_v24  ;;  %v1451_v20 = vsub.f32 %v3889_v6, %v1435_v30 }
 0x809   : > { %v3063_v48 = vpack.c.bf16 %v3261_v21, %v3260_v27 }
 0x80a   : > { %v1462_v22 = vmul.f32 1.442695, %v1451_v20 }
 0x80b   : > { %3064 = vmatprep.subr.bf16.mxu0 %v3063_v48  ;;  %v1432_v57 = vpop.xlane.xlu0 %1431 }
 0x80c   : > { %v1450_v1 = vsub.f32 %v1418_v9, %v1432_v57  ;;  %3066 = vmatpush3.bf16.msra.mxu0 %v3063_v48 }
 0x80e   : > { %v1460_v28 = vmul.f32 1.442695, %v1450_v1 }
 0x80f   : > { %v1441_v3 = vpop.xlane.xlu0 %1440 }
 0x810   : > { %3385 = vpow2.f32 %v1460_v28  ;;  %v1453_v2 = vsub.f32 %v1421_v14, %v1441_v3 }
 0x811   : > { %v3908_v0 = vpop.eup %3381 }
 0x812   : > { %v3910_v29 = vpop.eup %3383  ;;  %v1466_v59 = vmul.f32 1.442695, %v1453_v2  ;;  %v1475_v7 = vsel %vm587_vm3, %v3908_v0, 0.0 }
 0x813   : > { %1476 = vadd.xlane.f32.xlu0 %v1475_v7  ;;  %v1447_v12 = vpop.xlane.xlu0 %1446  ;;  %v1472_v13 = vsel %vm587_vm3, %v3910_v29, 0.0 }
 0x814   : > { %3387 = vpow2.f32 %v1466_v59  ;;  %1473 = vadd.xlane.f32.xlu1 %v1472_v13  ;;  %v1455_v11 = vsub.f32 %v3894_v17, %v1447_v12 }
 0x815   : > { %3389 = vpow2.f32 %v1462_v22 }
 0x816   : > { %v1470_v10 = vmul.f32 1.442695, %v1455_v11 }
 0x817   : > { %v3264_v9 = vpop.permute.xlu0 %3263 }
 0x818   : > { %v3266_v60 = vunpack.i.h.bf16 %v3264_v9  ;;  %v3265_v15 = vunpack.i.l.bf16 %v3264_v9 }
 0x81a   : > { %v3916_v8 = vpop.eup %3385  ;;  %v3067_v14 = vpack.c.bf16 %v3266_v60, %v3265_v15 }
 0x81b   : > { %v1478_v16 = vsel %vm587_vm3, %v3916_v8, 0.0 }
 0x81c   : > { %1479 = vadd.xlane.f32.xlu0 %v1478_v16  ;;  %3068 = vmatprep.subr.bf16.mxu0 %v3067_v14 }
 0x81d   : > { %3070 = vmatpush3.bf16.msra.mxu0 %v3067_v14 }
 0x81e   : > { %v3920_v5 = vpop.eup %3387 }
 0x81f   : > { %v1487_v63 = vsel %vm587_vm3, %v3920_v5, 0.0  ;;  %v3928_v57 = vpop.eup %3389 }
 0x820   : > { %1488 = vadd.xlane.f32.xlu0 %v1487_v63 }
 0x825   : > { %3278 = vrot.lane.b32.xlu1 %v3573_v35, %s3461_s16 }
 0x837   : > { %v1438_v23 = vpop.xlane.xlu1 %1437 }
 0x838   : > { %v1452_v25 = vsub.f32 %v1420_v18, %v1438_v23  ;;  %v1481_v18 = vsel %vm587_vm3, %v3928_v57, 0.0 }
 0x83a   : > { %v1464_v24 = vmul.f32 1.442695, %v1452_v25 }
 0x83b   : > { %v3269_v4 = vpop.permute.xlu1 %3268 }
 0x83c   : > { %3391 = vpow2.f32 %v1464_v24  ;;  %v3271_v21 = vunpack.i.h.bf16 %v3269_v4  ;;  %v3270_v27 = vunpack.i.l.bf16 %v3269_v4 }
 0x83d   : > { %3393 = vpow2.f32 %v1470_v10 }
 0x83e   : > { %v3071_v48 = vpack.c.bf16 %v3271_v21, %v3270_v27 }
 0x840   : > { %3072 = vmatprep.subr.bf16.mxu0 %v3071_v48 }
 0x841   : > { %3074 = vmatpush3.bf16.msra.mxu0 %v3071_v48 }
 0x846   : > { %v3930_v1 = vpop.eup %3391 }
 0x847   : > { %v1484_v6 = vsel %vm587_vm3, %v3930_v1, 0.0  ;;  %v3934_v17 = vpop.eup %3393 }
 0x848   : > { %1485 = vadd.xlane.f32.xlu0 %v1484_v6  ;;  %v1493_v30 = vsel %vm587_vm3, %v3934_v17, 0.0 }
 0x849   : > { %1482 = vadd.xlane.f32.xlu1 %v1481_v18 }
 0x84c   : > { %1494 = vadd.xlane.f32.xlu0 %v1493_v30 }
 0x85a   : > { %3288 = vrot.lane.b32.xlu1 %v3591_v45, %s3461_s16 }
 0x85e   : > { %3293 = vrot.lane.b32.xlu1 %v3600_v50, %s3461_s16 }
 0x862   : > { %1665 = vrot.lane.b32.xlu1 %v3567_v34, %s3462_s17 }
 0x866   : > { %1667 = vrot.lane.b32.xlu1 %v3565_v32, %s3462_s17 }
 0x86a   : > { %1671 = vrot.lane.b32.xlu1 %v3575_v37, %s3462_s17 }
 0x86c   : > { %v1444_v28 = vpop.xlane.xlu1 %1443 }
 0x86d   : > { %v1454_v3 = vsub.f32 %v3903_v19, %v1444_v28 }
 0x86e   : > { %1675 = vrot.lane.b32.xlu1 %v3584_v42, %s3462_s17 }
 0x86f   : > { %v1468_v2 = vmul.f32 1.442695, %v1454_v3 }
 0x870   : > { %v3274_v59 = vpop.permute.xlu1 %3273 }
 0x871   : > { %3395 = vpow2.f32 %v1468_v2  ;;  %v3276_v7 = vunpack.i.h.bf16 %v3274_v59  ;;  %v3275_v12 = vunpack.i.l.bf16 %v3274_v59 }
 0x872   : > { %1679 = vrot.lane.b32.xlu1 %v3593_v47, %s3462_s17 }
 0x873   : > { %v3075_v13 = vpack.c.bf16 %v3276_v7, %v3275_v12 }
 0x875   : > { %3076 = vmatprep.subr.bf16.mxu0 %v3075_v13 }
 0x876   : > { %3078 = vmatpush3.bf16.msra.mxu0 %v3075_v13 }
 0x87b   : > { %v3396_v34 = vpop.eup %3395 }
 0x87c   : > { %v1490_v32 = vsel %vm587_vm3, %v3396_v34, 0.0 }
 0x87d   : > { %1491 = vadd.xlane.f32.xlu0 %v1490_v32 }
 0x893   : > { %3283 = vrot.lane.b32.xlu0 %v3582_v40, %s3461_s16 }
 0x897   : > { %1669 = vrot.lane.b32.xlu0 %v3578_v39, %s3462_s17 }
 0x89b   : > { %1673 = vrot.lane.b32.xlu0 %v3587_v44, %s3462_s17 }
 0x89f   : > { %1677 = vrot.lane.b32.xlu0 %v3596_v49, %s3462_s17 }
 0x8a0   : > { %v1477_v37 = vpop.xlane.xlu0 %1476 }
 0x8a1   : > { %3397 = vrcp.f32 %v1477_v37  ;;  %v1474_v42 = vpop.xlane.xlu1 %1473 }
 0x8a2   : > { %3399 = vrcp.f32 %v1474_v42 }
 0x8a5   : > { %v3279_v47 = vpop.permute.xlu1 %3278 }
 0x8a6   : > { %v3281_v19 = vunpack.i.h.bf16 %v3279_v47  ;;  %v3280_v9 = vunpack.i.l.bf16 %v3279_v47 }
 0x8a8   : > { %v3079_v60 = vpack.c.bf16 %v3281_v19, %v3280_v9 }
 0x8a9   : > { %v1480_v15 = vpop.xlane.xlu0 %1479 }
 0x8aa   : > { %3401 = vrcp.f32 %v1480_v15  ;;  %3081 = vmatprep.subr.msk.bf16.mxu0 %vm3605_vm2, %v3079_v60 }
 0x8ab   : > { %v3398_v14 = vpop.eup %3397 }
 0x8ac   : > { %v3400_v16 = vpop.eup %3399  ;;  %v1505_v44 = vmul.f32 %v3398_v14, %v3908_v0 }
 0x8ad   : > { %v1504_v39 = vmul.f32 %v3400_v16, %v3910_v29  ;;  %v1489_v20 = vpop.xlane.xlu0 %1488 }
 0x8af   : > { %2863 = vmatprep.mubr.msk.f32.mxu0 %vm587_vm3, %v1504_v39 }
 0x8b0   : > { %2864 = vmatmul.mubr.msk.f32.vlgmr.msra.gmra.mrb[24].mxu0 %vm587_vm3, %v1505_v44 }
 0x8b1   : > { %3084 = vmatpush3.bf16.xpose.msk.msra.mxu0 %vm3605_vm2, %v3079_v60 }
 0x8b4   : > { %v3402_v49 = vpop.eup %3401 }
 0x8b5   : > { %v1506_v63 = vmul.f32 %v3402_v49, %v3916_v8 }
 0x8b7   : > { %2866 = vmatprep.mubr.msk.f32.mxu0 %vm587_vm3, %v1506_v63 }
 0x8d5   : > { %v1486_v11 = vpop.xlane.xlu0 %1485 }
 0x8d6   : > { %3403 = vrcp.f32 %v1486_v11  ;;  %v1483_v22 = vpop.xlane.xlu1 %1482 }
 0x8d7   : > { %3405 = vrcp.f32 %v1483_v22 }
 0x8d8   : > { %3407 = vrcp.f32 %v1489_v20 }
 0x8d9   : > { %v1495_v24 = vpop.xlane.xlu0 %1494 }
 0x8da   : > { %3409 = vrcp.f32 %v1495_v24  ;;  %v3289_v21 = vpop.permute.xlu1 %3288 }
 0x8db   : > { %v3291_v48 = vunpack.i.h.bf16 %v3289_v21  ;;  %v3290_v6 = vunpack.i.l.bf16 %v3289_v21 }
 0x8de   : > { %v3294_v28 = vpop.permute.xlu1 %3293 }
 0x8df   : > { %v3296_v59 = vunpack.i.h.bf16 %v3294_v28  ;;  %v3295_v7 = vunpack.i.l.bf16 %v3294_v28 }
 0x8e0   : > { %v3404_v29 = vpop.eup %3403 }
 0x8e1   : > { %v3406_v0 = vpop.eup %3405  ;;  %v1508_v10 = vmul.f32 %v3404_v29, %v3930_v1  ;;  %v3091_v1 = vpack.c.bf16 %v3291_v48, %v3290_v6  ;;  %v3097_v32 = vpack.c.bf16 %v3296_v59, %v3295_v7 }
 0x8e2   : > { %v1507_v23 = vmul.f32 %v3406_v0, %v3928_v57  ;;  %v3408_v25 = vpop.eup %3407  ;;  %v1666_v13 = vpop.permute.xlu1 %1665 }
 0x8e3   : > { %v1509_v8 = vmul.f32 %v3408_v25, %v3920_v5 }
 0x8e4   : > { %2867 = vmatmul.mubr.msk.f32.gmra.mrb[26].mxu0 %vm587_vm3, %v1507_v23  ;;  %v3410_v3 = vpop.eup %3409 }
 0x8e5   : > { %2869 = vmatprep.mubr.msk.f32.mxu0 %vm587_vm3, %v1508_v10  ;;  %v1511_v12 = vmul.f32 %v3410_v3, %v3934_v17 }
 0x8e6   : > { %v1668_v37 = vpop.permute.xlu1 %1667 }
 0x8e8   : > { %2870 = vmatmul.mubr.msk.f32.gmra.mrb[28].mxu0 %vm587_vm3, %v1509_v8 }
 0x8ea   : > { %v1672_v17 = vpop.permute.xlu1 %1671 }
 0x8ee   : > { %v1676_v47 = vpop.permute.xlu1 %1675 }
 0x8f2   : > { %v1680_v9 = vpop.permute.xlu1 %1679 }
 0x90a   : > { %v1492_v4 = vpop.xlane.xlu0 %1491 }
 0x90b   : > { %3411 = vrcp.f32 %v1492_v4 }
 0x90e   : > { %v3284_v27 = vpop.permute.xlu0 %3283 }
 0x90f   : > { %v3286_v57 = vunpack.i.h.bf16 %v3284_v27  ;;  %v3285_v18 = vunpack.i.l.bf16 %v3284_v27 }
 0x911   : > { %v3085_v30 = vpack.c.bf16 %v3286_v57, %v3285_v18 }
 0x913   : > { %3087 = vmatprep.subr.msk.bf16.mxu0 %vm3605_vm2, %v3085_v30 }
 0x914   : > { %3090 = vmatpush3.bf16.xpose.msk.msra.mxu0 %vm3605_vm2, %v3085_v30 }
 0x915   : > { %v3412_v5 = vpop.eup %3411  ;;  %3093 = vmatprep.subr.msk.bf16.mxu0 %vm3605_vm2, %v3091_v1 }
 0x916   : > { %v1510_v2 = vmul.f32 %v3412_v5, %v3396_v34  ;;  %v1670_v34 = vpop.permute.xlu0 %1669 }
 0x918   : > { %2872 = vmatprep.mubr.msk.f32.mxu0 %vm587_vm3, %v1510_v2 }
 0x919   : > { %2873 = vmatmul.mubr.msk.f32.gmra.mrb[30].mxu0 %vm587_vm3, %v1511_v12 }
 0x91a   : > { %2891 = vmatprep.mubr.msk.f32.mxu0 %vm441_vm1, %v1666_v13  ;;  %v1674_v42 = vpop.permute.xlu0 %1673 }
 0x91c   : > { %3096 = vmatpush3.bf16.xpose.msk.msra.mxu0 %vm3605_vm2, %v3091_v1 }
 0x91d   : > { %3099 = vmatprep.subr.msk.bf16.mxu0 %vm3605_vm2, %v3097_v32 }
 0x91e   : > { %v1678_v19 = vpop.permute.xlu0 %1677 }
 0x924   : > { %3102 = vmatpush3.bf16.xpose.msk.msra.mxu0 %vm3605_vm2, %v3097_v32 }
 0x92b   : > { %2892 = vmatmul.mubr.msk.f32.vlgmr.msra.gmra.mrb[32].mxu0 %vm441_vm1, %v1668_v37 }
 0x92c   : > { %2894 = vmatprep.mubr.msk.f32.mxu0 %vm441_vm1, %v1670_v34 }
 0x92f   : > { %2895 = vmatmul.mubr.msk.f32.gmra.mrb[34].mxu0 %vm441_vm1, %v1672_v17 }
 0x930   : > { %2897 = vmatprep.mubr.msk.f32.mxu0 %vm441_vm1, %v1674_v42 }
 0x933   : > { %2898 = vmatmul.mubr.msk.f32.gmra.mrb[36].mxu0 %vm441_vm1, %v1676_v47 }
 0x934   : > { %2900 = vmatprep.mubr.msk.f32.mxu0 %vm441_vm1, %v1678_v19 }
 0x937   : > { %2901 = vmatmul.mubr.msk.f32.gmra.mrb[38].mxu0 %vm441_vm1, %v1680_v9 }
 0x983   : > { %v3995_v54 = vpop.f32.mrb[24].mxu0 }
 0x984   : > { %v3997_v60 = vpop.f32.mrb[25].mxu0 }
 0x9b7   : > { %v3999_v15 = vpop.f32.mrb[26].mxu0 }
 0x9b8   : > { %v4001_v14 = vpop.f32.mrb[27].mxu0 }
 0x9bb   : > { %v4003_v16 = vpop.f32.mrb[28].mxu0 }
 0x9bc   : > { %v4005_v39 = vpop.f32.mrb[29].mxu0 }
 0x9ec   : > { %v4007_v44 = vpop.f32.mrb[30].mxu0 }
 0x9ed   : > { %v4009_v49 = vpop.f32.mrb[31].mxu0 }
 0x9fe   : > { %v2893_v63 = vpop.f32.mrb[32].mxu0 }
 0x9ff   : > { %v1835_v20 = vmul.f32 0.35355338, %v2893_v63  ;;  %v1795_v11 = vpop.f32.mrb[33].mxu0 }
 0xa00   : > { %v1834_v22 = vmul.f32 0.35355338, %v1795_v11 }
 0xa01   : > { %v1845_v29 = vsel %vm587_vm3, %v1835_v20, -inf }
 0xa02   : > { %1846 = vmax.xlane.f32.xlu1 %v1845_v29  ;;  %v2896_v0 = vpop.f32.mrb[34].mxu0  ;;  %v1842_v23 = vsel %vm587_vm3, %v1834_v22, -inf }
 0xa03   : > { %1843 = vmax.xlane.f32.xlu0 %v1842_v23  ;;  %v1805_v25 = vpop.f32.mrb[35].mxu0  ;;  %v1837_v8 = vmul.f32 0.35355338, %v2896_v0 }
 0xa04   : > { %v1836_v10 = vmul.f32 0.35355338, %v1805_v25 }
 0xa05   : > { %v1851_v57 = vsel %vm587_vm3, %v1837_v8, -inf }
 0xa06   : > { %v2899_v24 = vpop.f32.mrb[36].mxu0  ;;  %v1848_v4 = vsel %vm587_vm3, %v1836_v10, -inf }
 0xa07   : > { %1849 = vmax.xlane.f32.xlu0 %v1848_v4  ;;  %v1815_v21 = vpop.f32.mrb[37].mxu0  ;;  %v1839_v48 = vmul.f32 0.35355338, %v2899_v24 }
 0xa08   : > { %v1838_v27 = vmul.f32 0.35355338, %v1815_v21 }
 0xa09   : > { %v1857_v3 = vsel %vm587_vm3, %v1839_v48, -inf }
 0xa0a   : > { %v2902_v6 = vpop.f32.mrb[38].mxu0  ;;  %v1854_v18 = vsel %vm587_vm3, %v1838_v27, -inf }
 0xa0b   : > { %1852 = vmax.xlane.f32.xlu0 %v1851_v57  ;;  %1855 = vmax.xlane.f32.xlu1 %v1854_v18  ;;  %v1825_v30 = vpop.f32.mrb[39].mxu0  ;;  %v1841_v28 = vmul.f32 0.35355338, %v2902_v6 }
 0xa0c   : > { %v1840_v1 = vmul.f32 0.35355338, %v1825_v30 }
 0xa0d   : > { %v1863_v2 = vsel %vm587_vm3, %v1841_v28, -inf }
 0xa0e   : > { %v1860_v5 = vsel %vm587_vm3, %v1840_v1, -inf }
 0xa0f   : > { %1858 = vmax.xlane.f32.xlu0 %v1857_v3  ;;  %1861 = vmax.xlane.f32.xlu1 %v1860_v5 }
 0xa13   : > { %1864 = vmax.xlane.f32.xlu0 %v1863_v2 }
 0xa20   : > { %3298 = vrot.lane.b32.xlu1 %v3573_v35, %s3463_s18 }
 0xa8f   : > { %v1847_v59 = vpop.xlane.xlu1 %1846 }
 0xa90   : > { %v1867_v7 = vsub.f32 %v1835_v20, %v1847_v59  ;;  %v1844_v12 = vpop.xlane.xlu0 %1843 }
 0xa91   : > { %v1866_v13 = vsub.f32 %v1834_v22, %v1844_v12 }
 0xa92   : > { %v1876_v32 = vmul.f32 1.442695, %v1867_v7 }
 0xa93   : > { %v1874_v37 = vmul.f32 1.442695, %v1866_v13 }
 0xa94   : > { %3413 = vpow2.f32 %v1876_v32  ;;  %v1850_v34 = vpop.xlane.xlu0 %1849 }
 0xa95   : > { %3415 = vpow2.f32 %v1874_v37  ;;  %v1868_v17 = vsub.f32 %v1836_v10, %v1850_v34 }
 0xa97   : > { %v1878_v42 = vmul.f32 1.442695, %v1868_v17 }
 0xa98   : > { %v1853_v47 = vpop.xlane.xlu0 %1852  ;;  %v1856_v19 = vpop.xlane.xlu1 %1855 }
 0xa99   : > { %3417 = vpow2.f32 %v1878_v42  ;;  %v1869_v9 = vsub.f32 %v1837_v8, %v1853_v47  ;;  %v1870_v63 = vsub.f32 %v1838_v27, %v1856_v19 }
 0xa9b   : > { %v1880_v11 = vmul.f32 1.442695, %v1869_v9  ;;  %v1882_v29 = vmul.f32 1.442695, %v1870_v63 }
 0xa9c   : > { %v1859_v0 = vpop.xlane.xlu0 %1858  ;;  %v1862_v35 = vpop.xlane.xlu1 %1861 }
 0xa9d   : > { %3419 = vpow2.f32 %v1880_v11  ;;  %v1871_v20 = vsub.f32 %v1839_v48, %v1859_v0  ;;  %v1872_v24 = vsub.f32 %v1840_v1, %v1862_v35 }
 0xa9e   : > { %v4021_v23 = vpop.eup %3413  ;;  %3421 = vpow2.f32 %v1882_v29 }
 0xa9f   : > { %v4023_v22 = vpop.eup %3415  ;;  %v1884_v25 = vmul.f32 1.442695, %v1871_v20  ;;  %v1893_v10 = vsel %vm587_vm3, %v4021_v23, 0.0  ;;  %v1886_v18 = vmul.f32 1.442695, %v1872_v24 }
 0xaa0   : > { %1894 = vadd.xlane.f32.xlu0 %v1893_v10  ;;  %v1865_v4 = vpop.xlane.xlu0 %1864  ;;  %v3299_v8 = vpop.permute.xlu1 %3298  ;;  %v1890_v21 = vsel %vm587_vm3, %v4023_v22, 0.0 }
 0xaa1   : > { %3423 = vpow2.f32 %v1884_v25  ;;  %v1873_v27 = vsub.f32 %v1841_v28, %v1865_v4  ;;  %v3301_v6 = vunpack.i.h.bf16 %v3299_v8  ;;  %v3300_v48 = vunpack.i.l.bf16 %v3299_v8  ;;  %1891 = vadd.xlane.f32.xlu1 %v1890_v21  ;;  %v2205_v8 = vld [vmem:[%s4162_s4] sm:$0xff]  ;;  %v2206_v21 = vld [vmem:[%s4162_s4 + $0x8] sm:$0xff] }
 0xaa3   : > { %v3418_v57 = vpop.eup %3417  ;;  %v1888_v30 = vmul.f32 1.442695, %v1873_v27  ;;  %v3103_v3 = vpack.c.bf16 %v3301_v6, %v3300_v48  ;;  %v2207_v27 = vld [vmem:[%s4162_s4 + $0x10] sm:$0xff]  ;;  %v3119_v6 = vpack.c.bf16 %v2206_v21, %v2205_v8  ;;  %v2208_v48 = vld [vmem:[%s4162_s4 + $0x18] sm:$0xff] }
 0xaa4   : > { %v1896_v1 = vsel %vm587_vm3, %v3418_v57, 0.0 }
 0xaa5   : > { %3425 = vpow2.f32 %v1888_v30  ;;  %1897 = vadd.xlane.f32.xlu1 %v1896_v1  ;;  %3104 = vmatprep.subr.bf16.mxu0 %v3103_v3 }
 0xaa6   : > { %3127 = vmatprep.subr.bf16.mxu1 %v3103_v3  ;;  %3106 = vmatpush3.bf16.msra.mxu0 %v3103_v3  ;;  %3427 = vpow2.f32 %v1886_v18 }
 0xaa7   : > { %v4030_v5 = vpop.eup %3419  ;;  %3131 = vmatpush3.bf16.msra.mxu1 %v3103_v3 }
 0xaa8   : > { %v4032_v2 = vpop.eup %3421  ;;  %v1899_v28 = vsel %vm587_vm3, %v4030_v5, 0.0 }
 0xaa9   : > { %1900 = vadd.xlane.f32.xlu0 %v1899_v28  ;;  %v1902_v59 = vsel %vm587_vm3, %v4032_v2, 0.0 }
 0xaaa   : > { %1903 = vadd.xlane.f32.xlu1 %v1902_v59 }
 0xaab   : > { %v4038_v7 = vpop.eup %3423 }
 0xaac   : > { %v1905_v12 = vsel %vm587_vm3, %v4038_v7, 0.0 }
 0xaad   : > { %1906 = vadd.xlane.f32.xlu0 %v1905_v12 }
 0xaaf   : > { %v4042_v13 = vpop.eup %3425 }
 0xab0   : > { %v1911_v32 = vsel %vm587_vm3, %v4042_v13, 0.0  ;;  %v4046_v37 = vpop.eup %3427 }
 0xab1   : > { %1912 = vadd.xlane.f32.xlu0 %v1911_v32  ;;  %v1908_v34 = vsel %vm587_vm3, %v4046_v37, 0.0 }
 0xab5   : > { %1909 = vadd.xlane.f32.xlu0 %v1908_v34 }
 0xabb   : > { %3308 = vrot.lane.b32.xlu1 %v3591_v45, %s3463_s18 }
 0xabf   : > { %3313 = vrot.lane.b32.xlu1 %v3600_v50, %s3463_s18 }
 0xac3   : > { %2091 = vrot.lane.b32.xlu1 %v3873_v52, %s3464_s19 }
 0xac7   : > { %2093 = vrot.lane.b32.xlu1 %v3871_v51, %s3464_s19 }
 0xacb   : > { %2125 = vrot.lane.b32.xlu1 %v3995_v54, %s3465_s20  ;;  %3303 = vrot.lane.b32.xlu0 %v3582_v40, %s3463_s18 }
 0xacf   : > { %2097 = vrot.lane.b32.xlu1 %v3875_v53, %s3464_s19  ;;  %2123 = vrot.lane.b32.xlu0 %v3997_v60, %s3465_s20 }
 0xad3   : > { %2129 = vrot.lane.b32.xlu1 %v3999_v15, %s3465_s20  ;;  %2095 = vrot.lane.b32.xlu0 %v3877_v55, %s3464_s19 }
 0xad7   : > { %2101 = vrot.lane.b32.xlu1 %v3879_v56, %s3464_s19  ;;  %2127 = vrot.lane.b32.xlu0 %v4001_v14, %s3465_s20 }
 0xadb   : > { %2133 = vrot.lane.b32.xlu1 %v4003_v16, %s3465_s20  ;;  %2099 = vrot.lane.b32.xlu0 %v3881_v61, %s3464_s19 }
 0xadf   : > { %2105 = vrot.lane.b32.xlu1 %v3883_v62, %s3464_s19  ;;  %2131 = vrot.lane.b32.xlu0 %v4005_v39, %s3465_s20 }
 0xae3   : > { %2137 = vrot.lane.b32.xlu1 %v4007_v44, %s3465_s20  ;;  %2103 = vrot.lane.b32.xlu0 %v3885_v58, %s3464_s19 }
 0xae7   : > { %2135 = vrot.lane.b32.xlu0 %v4009_v49, %s3465_s20 }
 0xb2d   : > { %v1895_v45 = vpop.xlane.xlu0 %1894 }
 0xb2e   : > { %v1892_v40 = vpop.xlane.xlu1 %1891 }
 0xb2f   : > { %3429 = vrcp.f32 %v1892_v40 }
 0xb32   : > { %v1898_v50 = vpop.xlane.xlu1 %1897 }
 0xb33   : > { %3431 = vrcp.f32 %v1898_v50 }
 0xb34   : > { %3433 = vrcp.f32 %v1895_v45 }
 0xb36   : > { %v1901_v51 = vpop.xlane.xlu0 %1900 }
 0xb37   : > { %v1904_v56 = vpop.xlane.xlu1 %1903  ;;  %3435 = vrcp.f32 %v1901_v51 }
 0xb38   : > { %3437 = vrcp.f32 %v1904_v56 }
 0xb39   : > { %v3430_v52 = vpop.eup %3429 }
 0xb3a   : > { %v1907_v53 = vpop.xlane.xlu0 %1906  ;;  %v1922_v55 = vmul.f32 %v3430_v52, %v4023_v22 }
 0xb3b   : > { %v3309_v58 = vpop.permute.xlu1 %3308  ;;  %3439 = vrcp.f32 %v1907_v53 }
 0xb3c   : > { %2919 = vmatprep.mubr.msk.f32.mxu0 %vm587_vm3, %v1922_v55  ;;  %v3311_v14 = vunpack.i.h.bf16 %v3309_v58  ;;  %v3310_v16 = vunpack.i.l.bf16 %v3309_v58 }
 0xb3d   : > { %v3432_v61 = vpop.eup %3431 }
 0xb3e   : > { %v1913_v62 = vpop.xlane.xlu0 %1912  ;;  %v1924_v54 = vmul.f32 %v3432_v61, %v3418_v57  ;;  %v3111_v42 = vpack.c.bf16 %v3311_v14, %v3310_v16  ;;  %v3434_v63 = vpop.eup %3433  ;;  %v3123_v57 = vpack.c.bf16 %v2208_v48, %v2207_v27 }
 0xb3f   : > { %v3314_v49 = vpop.permute.xlu1 %3313  ;;  %v1923_v0 = vmul.f32 %v3434_v63, %v4021_v23 }
 0xb40   : > { %2922 = vmatprep.mubr.msk.f32.mxu1 %vm587_vm3, %v1924_v54  ;;  %v3316_v47 = vunpack.i.h.bf16 %v3314_v49  ;;  %v3315_v19 = vunpack.i.l.bf16 %v3314_v49 }
 0xb41   : > { %v3436_v11 = vpop.eup %3435 }
 0xb42   : > { %v1910_v60 = vpop.xlane.xlu0 %1909  ;;  %v3115_v9 = vpack.c.bf16 %v3316_v47, %v3315_v19  ;;  %v3438_v29 = vpop.eup %3437  ;;  %v1925_v35 = vmul.f32 %v3436_v11, %v4030_v5 }
 0xb43   : > { %3441 = vrcp.f32 %v1910_v60  ;;  %v1926_v22 = vmul.f32 %v3438_v29, %v4032_v2 }
 0xb44   : > { %3443 = vrcp.f32 %v1913_v62 }
 0xb45   : > { %v3440_v20 = vpop.eup %3439 }
 0xb46   : > { %v3304_v15 = vpop.permute.xlu0 %3303  ;;  %v1927_v24 = vmul.f32 %v3440_v20, %v4038_v7  ;;  %v2092_v7 = vpop.permute.xlu1 %2091 }
 0xb47   : > { %v3306_v39 = vunpack.i.h.bf16 %v3304_v15  ;;  %v3305_v44 = vunpack.i.l.bf16 %v3304_v15  ;;  %v2179_v54 = vsel %vm441_vm1, %v3749_v33, %v2092_v7 }
 0xb49   : > { %v3107_v17 = vpack.c.bf16 %v3306_v39, %v3305_v44 }
 0xb4a   : > { %v2094_v12 = vpop.permute.xlu1 %2093  ;;  %v2124_v32 = vpop.permute.xlu0 %2123 }
 0xb4b   : > { %3108 = vmatprep.subr.bf16.mxu0 %v3107_v17  ;;  %3128 = vmatprep.subr.bf16.mxu1 %v3107_v17  ;;  %v2180_v60 = vsel %vm441_vm1, %v3747_v31, %v2094_v12  ;;  %v2188_v15 = vsel %vm2187_vm4, %v2179_v54, %v2124_v32 }
 0xb4c   : > { %3110 = vmatpush3.bf16.msra.mxu0 %v3107_v17  ;;  %3132 = vmatpush3.bf16.msra.mxu1 %v3107_v17 }
 0xb4d   : > { %3112 = vmatprep.subr.bf16.mxu0 %v3111_v42  ;;  %3129 = vmatprep.subr.bf16.mxu1 %v3111_v42  ;;  %v3442_v25 = vpop.eup %3441 }
 0xb4e   : > { %v3444_v10 = vpop.eup %3443  ;;  %v1928_v4 = vmul.f32 %v3442_v25, %v4046_v37  ;;  %v2096_v34 = vpop.permute.xlu0 %2095 }
 0xb4f   : > { %v1929_v23 = vmul.f32 %v3444_v10, %v4042_v13  ;;  %v2126_v13 = vpop.permute.xlu1 %2125  ;;  %v2181_v49 = vsel %vm441_vm1, %v3753_v26, %v2096_v34 }
 0xb50   : > { %3114 = vmatpush3.bf16.msra.mxu0 %v3111_v42  ;;  %3133 = vmatpush3.bf16.msra.mxu1 %v3111_v42  ;;  %v2189_v16 = vsel %vm2187_vm4, %v2180_v60, %v2126_v13 }
 0xb51   : > { %3116 = vmatprep.subr.bf16.mxu0 %v3115_v9  ;;  %3130 = vmatprep.subr.bf16.mxu1 %v3115_v9 }
 0xb52   : > { %v2128_v45 = vpop.permute.xlu0 %2127 }
 0xb53   : > { %v2098_v37 = vpop.permute.xlu1 %2097  ;;  %v2190_v33 = vsel %vm2187_vm4, %v2181_v49, %v2128_v45 }
 0xb54   : > { %3118 = vmatpush3.bf16.msra.mxu0 %v3115_v9  ;;  %3134 = vmatpush3.bf16.msra.mxu1 %v3115_v9  ;;  %v2182_v31 = vsel %vm441_vm1, %v3751_v36, %v2098_v37 }
 0xb55   : > { %3120 = vmatprep.subr.bf16.mxu1 %v3119_v6 }
 0xb56   : > { %v2100_v51 = vpop.permute.xlu0 %2099 }
 0xb57   : > { %2920 = vmatmul.mubr.msk.f32.vlgmr.msra.gmra.mrb[40].mxu0 %vm587_vm3, %v1923_v0  ;;  %2923 = vmatmul.mubr.msk.f32.vlgmr.msra.gmra.mrb[24].mxu1 %vm587_vm3, %v1925_v35  ;;  %v2130_v40 = vpop.permute.xlu1 %2129  ;;  %v2183_v26 = vsel %vm441_vm1, %v3757_v41, %v2100_v51 }
 0xb58   : > { %2925 = vmatprep.mubr.msk.f32.mxu1 %vm587_vm3, %v1926_v22  ;;  %3122 = vmatpush3.bf16.msra.mxu1 %v3119_v6  ;;  %v2191_v47 = vsel %vm2187_vm4, %v2182_v31, %v2130_v40 }
 0xb59   : > { %3124 = vmatprep.subr.bf16.mxu1 %v3123_v57 }
 0xb5a   : > { %v2132_v53 = vpop.permute.xlu0 %2131 }
 0xb5b   : > { %2926 = vmatmul.mubr.msk.f32.gmra.mrb[26].mxu1 %vm587_vm3, %v1927_v24  ;;  %v2102_v50 = vpop.permute.xlu1 %2101  ;;  %v2192_v11 = vsel %vm2187_vm4, %v2183_v26, %v2132_v53 }
 0xb5c   : > { %2928 = vmatprep.mubr.msk.f32.mxu1 %vm587_vm3, %v1928_v4  ;;  %3126 = vmatpush3.bf16.msra.mxu1 %v3123_v57  ;;  %v2184_v36 = vsel %vm441_vm1, %v3755_v38, %v2102_v50 }
 0xb5e   : > { %v2104_v56 = vpop.permute.xlu0 %2103 }
 0xb5f   : > { %2929 = vmatmul.mubr.msk.f32.gmra.mrb[28].mxu1 %vm587_vm3, %v1929_v23  ;;  %v2134_v52 = vpop.permute.xlu1 %2133  ;;  %v2185_v41 = vsel %vm441_vm1, %v3761_v46, %v2104_v56  ;;  %v2522_v46 = vld [vmem:[%s4163_s5] ss:$0 sm:$0xff] }
 0xb60   : > { %v2193_v0 = vsel %vm2187_vm4, %v2184_v36, %v2134_v52 }
 0xb62   : > { %v2136_v62 = vpop.permute.xlu0 %2135 }
 0xb63   : > { %v2106_v55 = vpop.permute.xlu1 %2105  ;;  %v2194_v25 = vsel %vm2187_vm4, %v2185_v41, %v2136_v62 }
 0xb64   : > { %v2186_v38 = vsel %vm441_vm1, %v3759_v43, %v2106_v55 }
 0xb67   : > { %v2138_v61 = vpop.permute.xlu1 %2137 }
 0xb68   : > { %v2195_v10 = vsel %vm2187_vm4, %v2186_v38, %v2138_v61 }
 0xc2a   : > { %v2921_v18 = vpop.f32.mrb[40].mxu0  ;;  %v2924_v30 = vpop.f32.mrb[24].mxu1 }
 0xc2b   : > { %v2054_v3 = vpop.f32.mrb[25].mxu1  ;;  %2157 = vrot.lane.b32.xlu1 %v2921_v18, %s3466_s8  ;;  %v2044_v1 = vpop.f32.mrb[41].mxu0 }
 0xc2c   : > { %2155 = vrot.lane.b32.xlu0 %v2044_v1, %s3466_s8 }
 0xc2e   : > { %v2927_v5 = vpop.f32.mrb[26].mxu1 }
 0xc2f   : > { %v2064_v2 = vpop.f32.mrb[27].mxu1  ;;  %2161 = vrot.lane.b32.xlu1 %v2924_v30, %s3466_s8 }
 0xc30   : > { %2159 = vrot.lane.b32.xlu0 %v2054_v3, %s3466_s8 }
 0xc32   : > { %v2930_v28 = vpop.f32.mrb[28].mxu1 }
 0xc33   : > { %v2074_v59 = vpop.f32.mrb[29].mxu1  ;;  %2165 = vrot.lane.b32.xlu1 %v2927_v5, %s3466_s8 }
 0xc34   : > { %2163 = vrot.lane.b32.xlu0 %v2064_v2, %s3466_s8 }
 0xc37   : > { %2169 = vrot.lane.b32.xlu1 %v2930_v28, %s3466_s8 }
 0xc38   : > { %2167 = vrot.lane.b32.xlu0 %v2074_v59, %s3466_s8 }
 0xc9d   : > { %v2158_v58 = vpop.permute.xlu1 %2157 }
 0xc9e   : > { %v2156_v14 = vpop.permute.xlu0 %2155  ;;  %v2198_v44 = vsel %vm2196_vm5, %v2189_v16, %v2158_v58 }
 0xc9f   : > { %v2197_v39 = vsel %vm2196_vm5, %v2188_v15, %v2156_v14 }
 0xca0   : > { %2939 = vmatprep.mubr.msk.f32.mxu1 %vm287_vm0, %v2197_v39 }
 0xca1   : > { %v2162_v17 = vpop.permute.xlu1 %2161  ;;  %2940 = vmatmul.mubr.msk.f32.vlgmr.msra.gmra.mrb[30].mxu1 %vm287_vm0, %v2198_v44 }
 0xca2   : > { %v2160_v42 = vpop.permute.xlu0 %2159  ;;  %v2200_v9 = vsel %vm2196_vm5, %v2191_v47, %v2162_v17 }
 0xca3   : > { %v2199_v19 = vsel %vm2196_vm5, %v2190_v33, %v2160_v42 }
 0xca4   : > { %2942 = vmatprep.mubr.msk.f32.mxu1 %vm287_vm0, %v2199_v19 }
 0xca5   : > { %v2166_v63 = vpop.permute.xlu1 %2165  ;;  %2943 = vmatmul.mubr.msk.f32.gmra.mrb[32].mxu1 %vm287_vm0, %v2200_v9 }
 0xca6   : > { %v2164_v29 = vpop.permute.xlu0 %2163  ;;  %v2202_v20 = vsel %vm2196_vm5, %v2193_v0, %v2166_v63 }
 0xca7   : > { %v2201_v35 = vsel %vm2196_vm5, %v2192_v11, %v2164_v29 }
 0xca8   : > { %2945 = vmatprep.mubr.msk.f32.mxu1 %vm287_vm0, %v2201_v35 }
 0xca9   : > { %v2170_v22 = vpop.permute.xlu1 %2169  ;;  %2946 = vmatmul.mubr.msk.f32.gmra.mrb[34].mxu1 %vm287_vm0, %v2202_v20 }
 0xcaa   : > { %v2168_v24 = vpop.permute.xlu0 %2167  ;;  %v2204_v23 = vsel %vm2196_vm5, %v2195_v10, %v2170_v22 }
 0xcab   : > { %v2203_v4 = vsel %vm2196_vm5, %v2194_v25, %v2168_v24 }
 0xcac   : > { %2948 = vmatprep.mubr.msk.f32.mxu1 %vm287_vm0, %v2203_v4 }
 0xcad   : > { %2949 = vmatmul.mubr.msk.f32.gmra.mrb[36].mxu1 %vm287_vm0, %v2204_v23 }
 0xd74   : > { %v2941_v43 = vpop.f32.mrb[30].mxu1 }
 0xd75   : > { %v2312_v8 = vadd.f32 %v2941_v43, %v2522_v46  ;;  %v2306_v21 = vpop.f32.mrb[31].mxu1 }
 0xd76   : > { %v2307_v27 = vadd.f32 %v2522_v46, %v2306_v21 }
 0xd77   : > { %2346 = vst.msk [vmem:[%s251_s13 + $0x8] sm:$0xff] %vm287_vm0, %v2312_v8 }
 0xd78   : > { %2345 = vst.msk [vmem:[%s251_s13] sm:$0xff] %vm287_vm0, %v2307_v27  ;;  %v2944_v6 = vpop.f32.mrb[32].mxu1 }
 0xd79   : > { %v2322_v48 = vadd.f32 %v2944_v6, %v2522_v46  ;;  %v2316_v57 = vpop.f32.mrb[33].mxu1 }
 0xd7a   : > { %v2317_v18 = vadd.f32 %v2522_v46, %v2316_v57 }
 0xd7b   : > { %2348 = vst.msk [vmem:[%s251_s13 + $0x18] sm:$0xff] %vm287_vm0, %v2322_v48 }
 0xd7c   : > { %2347 = vst.msk [vmem:[%s251_s13 + $0x10] sm:$0xff] %vm287_vm0, %v2317_v18  ;;  %v2947_v30 = vpop.f32.mrb[34].mxu1 }
 0xd7d   : > { %v2332_v3 = vadd.f32 %v2947_v30, %v2522_v46  ;;  %v2326_v1 = vpop.f32.mrb[35].mxu1 }
 0xd7e   : > { %v2327_v5 = vadd.f32 %v2522_v46, %v2326_v1 }
 0xd7f   : > { %2350 = vst.msk [vmem:[%s251_s13 + $0x28] sm:$0xff] %vm287_vm0, %v2332_v3 }
 0xd80   : > { %2349 = vst.msk [vmem:[%s251_s13 + $0x20] sm:$0xff] %vm287_vm0, %v2327_v5  ;;  %v2950_v2 = vpop.f32.mrb[36].mxu1 }
 0xd81   : > { %v2342_v28 = vadd.f32 %v2950_v2, %v2522_v46  ;;  %v2336_v59 = vpop.f32.mrb[37].mxu1 }
 0xd82   : > { %v2337_v7 = vadd.f32 %v2522_v46, %v2336_v59 }
 0xd83   : > { %2352 = vst.msk [vmem:[%s251_s13 + $0x38] sm:$0xff] %vm287_vm0, %v2342_v28 }
 0xd84   : > { %2351 = vst.msk [vmem:[%s251_s13 + $0x30] sm:$0xff] %vm287_vm0, %v2337_v7 }
 0xd85 PF: > { %s16_s21 = sadd.s32 1, %s3451_s21  }
 0xd86   : > { %p13_p4 = scmp.ge.s32.totalorder %s16_s21, 4  }
 0xd88   :  { %15 = sbr.rel (!%p13_p4) target bundleno = 1 (0x1), region = 74 }

</bundles_post_ra>
